<compile_context>
chip_gen: v7x
topology: tpu7x:2x2x1
jax: 0.10.0
libtpu: 0.0.40
codegen_flags: <defaults>
</compile_context>

<pallas_src>
import functools

import jax
import jax.numpy as jnp
from jax.experimental import pallas as pl
from jax.experimental.pallas import tpu as pltpu

EPS = 1e-5  # nn.InstanceNorm2d default eps (affine=False in this module config)


def _vgg_block_kernel(x_ref, band_ref, gather_ref, scatter_ref, *refs,
                      Nb, H, W, C_out, KH, pool):
    """Fused Conv2d(3x3,pad=1) + InstanceNorm2d(affine=False) + ReLU [+ MaxPool2d(2,2)].

    x_ref:       (Nb, H+2, (W+2)*C_in)  bf16, zero-padded, (w, c_in) flattened into lanes
    band_ref:    (KH, (W+2)*C_in, L)    bf16 banded (Toeplitz) conv weights, L = W*C_out
    gather_ref:  (L, C_out) f32 0/1: sums the lanes of one channel          (IN stats)
    scatter_ref: (C_out, L) f32 0/1: broadcasts per-channel scalars to lanes
    if pool, refs = (rsel_even, rsel_odd, comp, o_ref):
      rsel_even/odd: (Nb*H//2, Nb*H)      f32 0/1 row-pair selectors
      comp:          (L, (W//2)*C_out)    f32 0/1 even-width-group compaction
      o_ref:         (Nb, H//2, (W//2)*C_out) f32
    else refs = (o_ref,), o_ref: (Nb, H, L) f32
    """
    if pool:
        rsel_e_ref, rsel_o_ref, comp_ref, o_ref = refs
    else:
        (o_ref,) = refs

    f32 = jnp.float32
    L = W * C_out
    M = Nb * H

    xs = x_ref[...]                                               # (Nb, H+2, Kw) bf16

    # ---- conv: KH banded bf16 MXU matmuls with M = Nb*H, f32 accumulation ----
    acc = jnp.dot(xs[:, 0:H, :].reshape(M, -1), band_ref[0],
                  preferred_element_type=f32)                     # (M, L)
    for kh in range(1, KH):
        acc = acc + jnp.dot(xs[:, kh:kh + H, :].reshape(M, -1), band_ref[kh],
                            preferred_element_type=f32)
    # conv bias intentionally omitted: cancelled by the InstanceNorm mean subtraction.

    # ---- InstanceNorm2d (affine=False): per-(instance, channel) stats over H*W ----
    area = float(H * W)
    acc3 = acc.reshape(Nb, H, L)
    col_sum = jnp.sum(acc3, axis=1)                               # (Nb, L)  sublane reduce (XLU)
    mean_c = jnp.dot(col_sum, gather_ref[...], preferred_element_type=f32) / area
    mean_l = jnp.dot(mean_c, scatter_ref[...], preferred_element_type=f32)   # (Nb, L)
    cent3 = acc3 - mean_l[:, None, :]
    sq_sum = jnp.sum(cent3 * cent3, axis=1)                       # (Nb, L)  two-pass variance
    var_c = jnp.dot(sq_sum, gather_ref[...], preferred_element_type=f32) / area
    inv_c = jax.lax.rsqrt(var_c + EPS)                            # EUP
    inv_l = jnp.dot(inv_c, scatter_ref[...], preferred_element_type=f32)     # (Nb, L)
    y3 = jnp.maximum(cent3 * inv_l[:, None, :], 0.0)              # ReLU, (Nb, H, L)

    if not pool:
        o_ref[...] = y3
        return

    # ---- MaxPool2d(kernel=2, stride=2) ----
    y2 = y3.reshape(M, L)
    # row-pair max via tiny host-precomputed 0/1 selection matmuls (rows are sublanes -> MXU)
    hmax = jnp.maximum(jnp.dot(rsel_e_ref[...], y2, preferred_element_type=f32),
                       jnp.dot(rsel_o_ref[...], y2, preferred_element_type=f32))  # (M//2, L)
    # width-pair max: roll lanes by C_out (XLU, jnp.roll semantics) so lane l sees lane l+C_out,
    # take the elementwise max, then compact even width groups with ONE 0/1 matmul (L -> L/2).
    rolled = pltpu.roll(hmax, L - C_out, 1)
    wmax = jnp.maximum(hmax, rolled)
    pooled = jnp.dot(wmax, comp_ref[...], preferred_element_type=f32)          # (M//2, L//2)
    o_ref[...] = pooled.reshape(Nb, H // 2, (W // 2) * C_out)


def _build_banded_weights(w, W):
    """w: (KH, KW, C_in, C_out) -> (KH, (W+KW-1)*C_in, W*C_out) banded matmul operands.

    band[kh, wi*C_in + ci, wo*C_out + co] = w[kh, wi - wo, ci, co] when 0 <= wi-wo < KW, so
    conv output row h is  sum_kh  x_pad[h+kh] @ band[kh]  in the lane-flattened layout.
    """
    KH, KW, C_in, C_out = w.shape
    Wp = W + KW - 1                                    # padded width (pad=1 each side)
    wi = jnp.arange(Wp)[:, None]
    wo = jnp.arange(W)[None, :]
    kw = wi - wo
    valid = (kw >= 0) & (kw < KW)                      # (Wp, W)
    taps = w[:, jnp.clip(kw, 0, KW - 1)]               # (KH, Wp, W, C_in, C_out)
    taps = jnp.where(valid[None, :, :, None, None], taps, 0.0)
    taps = jnp.transpose(taps, (0, 1, 3, 2, 4))        # (KH, Wp, C_in, W, C_out)
    return taps.reshape(KH, Wp * C_in, W * C_out)


def _channel_gather_scatter(W, C_out):
    L = W * C_out
    gather = (jnp.arange(L)[:, None] % C_out == jnp.arange(C_out)[None, :]).astype(jnp.float32)
    return gather, gather.T                            # (L, C_out), (C_out, L)


def _pool_selectors(M, W, C_out):
    """Row-pair 0/1 selectors over the M = Nb*H stacked rows and the width compaction matrix."""
    r_out = jnp.arange(M // 2)[:, None]
    r_in = jnp.arange(M)[None, :]
    rsel_e = (r_in == 2 * r_out).astype(jnp.float32)               # (M//2, M)
    rsel_o = (r_in == 2 * r_out + 1).astype(jnp.float32)
    L, Lh = W * C_out, (W // 2) * C_out
    li = jnp.arange(L)[:, None]
    lj = jnp.arange(Lh)[None, :]
    comp = ((li % C_out == lj % C_out)
            & (li // C_out == 2 * (lj // C_out))).astype(jnp.float32)  # (L, Lh)
    return rsel_e, rsel_o, comp


def _pick_batch_tile(N, H):
    """Largest per-step batch Nb (divisor of N) with conv matmul M = Nb*H near the 256-deep MXU,
    preferring >= 2 grid steps (DMA/compute overlap + v7x megacore) when N allows."""
    cap = max(1, 256 // max(H, 1))
    divisors = [nb for nb in range(1, N + 1) if N % nb == 0]
    fits = [nb for nb in divisors if nb <= cap] or [1]
    nb = max(fits)
    if N // nb < 2:
        two_steps = [d for d in fits if N // d >= 2]
        if two_steps:
            nb = max(two_steps)
    return nb


def vgg_block2d_forward(x_nchw, w, b=None, *, stride=1, nb=None):
    """Forward of VggBlock2D (norm='InstanceNorm2d', activation='ReLU').

    x_nchw: (N, C_in, H, W); w: (3, 3, C_in, C_out) (HWIO; a PyTorch OIHW tensor would be
    transpose(2, 3, 1, 0)); b: (C_out,) conv bias, accepted for interface parity but unused —
    InstanceNorm2d(affine=False) subtracts the per-channel mean, which absorbs it. Returns NCHW.
    """
    del b
    N, C_in, H, W = x_nchw.shape
    KH, KW, _, C_out = w.shape
    assert (KH, KW) == (3, 3), "module fixes kernel_size=3, padding=1"
    assert stride in (1, 2)
    pool = stride == 2
    if pool:
        assert H % 2 == 0 and W % 2 == 0

    Nb = nb if nb is not None else _pick_batch_tile(N, H)
    assert N % Nb == 0

    # NCHW -> NHWC, zero-pad spatially by 1, flatten (w, c_in) into lanes, cast to bf16.
    x_nhwc = jnp.transpose(x_nchw, (0, 2, 3, 1))
    x_pad = jnp.pad(x_nhwc, ((0, 0), (1, 1), (1, 1), (0, 0)))
    x_flat = x_pad.reshape(N, H + 2, (W + 2) * C_in).astype(jnp.bfloat16)

    band = _build_banded_weights(w, W).astype(jnp.bfloat16)        # (KH, (W+2)*C_in, W*C_out)
    gather_c, scatter_c = _channel_gather_scatter(W, C_out)
    consts = [band, gather_c, scatter_c]
    if pool:
        consts += list(_pool_selectors(Nb * H, W, C_out))

    H_out = H // 2 if pool else H
    L_out = (W // 2 if pool else W) * C_out

    kernel = functools.partial(_vgg_block_kernel, Nb=Nb, H=H, W=W, C_out=C_out,
                               KH=KH, pool=pool)

    def call(single_buffer_consts):
        def const_spec(arr):
            zeros = (lambda n: (0, 0, 0)) if arr.ndim == 3 else (lambda n: (0, 0))
            if single_buffer_consts:
                return pl.BlockSpec(arr.shape, zeros, pipeline_mode=pl.Buffered(1))
            return pl.BlockSpec(arr.shape, zeros)

        return pl.pallas_call(
            kernel,
            out_shape=jax.ShapeDtypeStruct((N, H_out, L_out), jnp.float32),
            grid=(N // Nb,),
            in_specs=[pl.BlockSpec((Nb, H + 2, (W + 2) * C_in), lambda n: (n, 0, 0))]
                     + [const_spec(c) for c in consts],
            out_specs=pl.BlockSpec((Nb, H_out, L_out), lambda n: (n, 0, 0)),
            compiler_params=pltpu.CompilerParams(dimension_semantics=("parallel",)),
        )(x_flat, *consts)

    try:
        out = call(True)            # constants single-buffered (no double-buffer for the band)
        jax.block_until_ready(out)
    except Exception:               # fallback if this JAX build rejects Buffered(1) constants
        out = call(False)

    W_out = L_out // C_out
    return jnp.transpose(out.reshape(N, H_out, W_out, C_out), (0, 3, 1, 2))


def _reference_forward(x_nchw, w, b, *, stride=1):
    """Pure-JAX f32 reference matching the PyTorch module semantics (bias included)."""
    x = jnp.transpose(x_nchw, (0, 2, 3, 1))
    y = jax.lax.conv_general_dilated(
        x, w, window_strides=(1, 1), padding="SAME",
        dimension_numbers=("NHWC", "HWIO", "NHWC"),
        precision=jax.lax.Precision.HIGHEST)
    y = y + b.reshape(1, 1, 1, -1)
    mean = jnp.mean(y, axis=(1, 2), keepdims=True)
    var = jnp.mean((y - mean) ** 2, axis=(1, 2), keepdims=True)
    y = jnp.maximum((y - mean) * jax.lax.rsqrt(var + EPS), 0.0)
    if stride == 2:
        n, hh, ww, c = y.shape
        y = jnp.max(y.reshape(n, hh // 2, 2, ww // 2, 2, c), axis=(2, 4))
    return jnp.transpose(y, (0, 3, 1, 2))


if __name__ == "__main__":
    # N=4 so the Nb=2 batch tiling actually kicks in while keeping grid=(2,) for megacore.
    N, C_in, C_out, H, W = 4, 4, 8, 16, 16
    key = jax.random.PRNGKey(0)
    kx, kw, kb = jax.random.split(key, 3)
    x = jax.random.normal(kx, (N, C_in, H, W), jnp.float32)
    w = 0.1 * jax.random.normal(kw, (3, 3, C_in, C_out), jnp.float32)
    b = 0.1 * jax.random.normal(kb, (C_out,), jnp.float32)

    # tolerance loosened vs the pure-f32 banded version because conv operands are bf16 on the MXU
    TOL = dict(atol=3e-2, rtol=3e-2)

    # stride=2: conv -> InstanceNorm -> ReLU -> MaxPool2d(2,2)
    out2 = vgg_block2d_forward(x, w, b, stride=2)
    jax.block_until_ready(out2)
    assert out2.shape == (N, C_out, H // 2, W // 2), out2.shape
    ref2 = _reference_forward(x, w, b, stride=2)
    assert jnp.allclose(out2, ref2, **TOL), float(jnp.max(jnp.abs(out2 - ref2)))

    # stride=1: no pooling
    out1 = vgg_block2d_forward(x, w, b, stride=1)
    jax.block_until_ready(out1)
    assert out1.shape == (N, C_out, H, W), out1.shape
    ref1 = _reference_forward(x, w, b, stride=1)
    assert jnp.allclose(out1, ref1, **TOL), float(jnp.max(jnp.abs(out1 - ref1)))

    print("KERNEL_OK")
</pallas_src>

<mosaic_0001>
module attributes {stable_mosaic.version = 11 : i64} {
  func.func @_vgg_block_kernel(%arg0: i32, %arg1: memref<2x18x72xbf16, #tpu.memory_space<vmem>>, %arg2: memref<3x72x128xbf16, #tpu.memory_space<vmem>>, %arg3: memref<128x8xf32, #tpu.memory_space<vmem>>, %arg4: memref<8x128xf32, #tpu.memory_space<vmem>>, %arg5: memref<16x32xf32, #tpu.memory_space<vmem>>, %arg6: memref<16x32xf32, #tpu.memory_space<vmem>>, %arg7: memref<128x64xf32, #tpu.memory_space<vmem>>, %arg8: memref<2x8x64xf32, #tpu.memory_space<vmem>>) attributes {dimension_semantics = [#tpu.dimension_semantics<parallel>], iteration_bounds = array<i64: 2>, scalar_prefetch = 0 : i64, scratch_operands = 0 : i64, tpu.core_type = #tpu.core_type<tc>, window_params = [{transform_indices = @transform_0, window_bounds = array<i64: 2, 18, 72>}, {pipeline_mode = #tpu.pipeline_mode<synchronous>, transform_indices = @transform_1, window_bounds = array<i64: 3, 72, 128>}, {pipeline_mode = #tpu.pipeline_mode<synchronous>, transform_indices = @transform_2, window_bounds = array<i64: 128, 8>}, {pipeline_mode = #tpu.pipeline_mode<synchronous>, transform_indices = @transform_3, window_bounds = array<i64: 8, 128>}, {pipeline_mode = #tpu.pipeline_mode<synchronous>, transform_indices = @transform_4, window_bounds = array<i64: 16, 32>}, {pipeline_mode = #tpu.pipeline_mode<synchronous>, transform_indices = @transform_5, window_bounds = array<i64: 16, 32>}, {pipeline_mode = #tpu.pipeline_mode<synchronous>, transform_indices = @transform_6, window_bounds = array<i64: 128, 64>}, {transform_indices = @transform_7, window_bounds = array<i64: 2, 8, 64>}]} {
    %c0 = arith.constant 0 : index
    %c0_0 = arith.constant 0 : index
    %c0_1 = arith.constant 0 : index
    %0 = vector.load %arg1[%c0, %c0_0, %c0_1] : memref<2x18x72xbf16, #tpu.memory_space<vmem>>, vector<2x18x72xbf16>
    %1 = vector.extract_strided_slice %0 {offsets = [0, 0, 0], sizes = [2, 16, 72], strides = [1, 1, 1]} : vector<2x18x72xbf16> to vector<2x16x72xbf16>
    %2 = vector.shape_cast %1 : vector<2x16x72xbf16> to vector<32x72xbf16>
    %c0_2 = arith.constant 0 : index
    %c0_3 = arith.constant 0 : index
    %c0_4 = arith.constant 0 : index
    %3 = vector.load %arg2[%c0_2, %c0_3, %c0_4] : memref<3x72x128xbf16, #tpu.memory_space<vmem>>, vector<1x72x128xbf16>
    %4 = vector.shape_cast %3 : vector<1x72x128xbf16> to vector<72x128xbf16>
    %cst = arith.constant dense<0.000000e+00> : vector<32x128xf32>
    %5 = tpu.matmul %2, %4, %cst {dimension_numbers = #tpu.dot_dimension_numbers<[1], [0], [0], [1], [0, 0, 1, 1], [], []>} : vector<32x72xbf16>, vector<72x128xbf16>, vector<32x128xf32> -> vector<32x128xf32>
    %6 = vector.extract_strided_slice %0 {offsets = [0, 1, 0], sizes = [2, 16, 72], strides = [1, 1, 1]} : vector<2x18x72xbf16> to vector<2x16x72xbf16>
    %7 = vector.shape_cast %6 : vector<2x16x72xbf16> to vector<32x72xbf16>
    %c1 = arith.constant 1 : index
    %c0_5 = arith.constant 0 : index
    %c0_6 = arith.constant 0 : index
    %8 = vector.load %arg2[%c1, %c0_5, %c0_6] : memref<3x72x128xbf16, #tpu.memory_space<vmem>>, vector<1x72x128xbf16>
    %9 = vector.shape_cast %8 : vector<1x72x128xbf16> to vector<72x128xbf16>
    %cst_7 = arith.constant dense<0.000000e+00> : vector<32x128xf32>
    %10 = tpu.matmul %7, %9, %cst_7 {dimension_numbers = #tpu.dot_dimension_numbers<[1], [0], [0], [1], [0, 0, 1, 1], [], []>} : vector<32x72xbf16>, vector<72x128xbf16>, vector<32x128xf32> -> vector<32x128xf32>
    %11 = arith.addf %5, %10 : vector<32x128xf32>
    %12 = vector.extract_strided_slice %0 {offsets = [0, 2, 0], sizes = [2, 16, 72], strides = [1, 1, 1]} : vector<2x18x72xbf16> to vector<2x16x72xbf16>
    %13 = vector.shape_cast %12 : vector<2x16x72xbf16> to vector<32x72xbf16>
    %c2 = arith.constant 2 : index
    %c0_8 = arith.constant 0 : index
    %c0_9 = arith.constant 0 : index
    %14 = vector.load %arg2[%c2, %c0_8, %c0_9] : memref<3x72x128xbf16, #tpu.memory_space<vmem>>, vector<1x72x128xbf16>
    %15 = vector.shape_cast %14 : vector<1x72x128xbf16> to vector<72x128xbf16>
    %cst_10 = arith.constant dense<0.000000e+00> : vector<32x128xf32>
    %16 = tpu.matmul %13, %15, %cst_10 {dimension_numbers = #tpu.dot_dimension_numbers<[1], [0], [0], [1], [0, 0, 1, 1], [], []>} : vector<32x72xbf16>, vector<72x128xbf16>, vector<32x128xf32> -> vector<32x128xf32>
    %17 = arith.addf %11, %16 : vector<32x128xf32>
    %18 = vector.shape_cast %17 : vector<32x128xf32> to vector<2x16x128xf32>
    %cst_11 = arith.constant dense<0.000000e+00> : vector<2x128xf32>
    %19 = vector.multi_reduction <add>, %18, %cst_11 [1] : vector<2x16x128xf32> to vector<2x128xf32>
    %c0_12 = arith.constant 0 : index
    %c0_13 = arith.constant 0 : index
    %20 = vector.load %arg3[%c0_12, %c0_13] : memref<128x8xf32, #tpu.memory_space<vmem>>, vector<128x8xf32>
    %cst_14 = arith.constant dense<0.000000e+00> : vector<2x8xf32>
    %21 = tpu.matmul %19, %20, %cst_14 {dimension_numbers = #tpu.dot_dimension_numbers<[1], [0], [0], [1], [0, 0, 1, 1], [], []>} : vector<2x128xf32>, vector<128x8xf32>, vector<2x8xf32> -> vector<2x8xf32>
    %cst_15 = arith.constant 2.560000e+02 : f32
    %22 = vector.broadcast %cst_15 : f32 to vector<2x8xf32>
    %23 = arith.divf %21, %22 : vector<2x8xf32>
    %c0_16 = arith.constant 0 : index
    %c0_17 = arith.constant 0 : index
    %24 = vector.load %arg4[%c0_16, %c0_17] : memref<8x128xf32, #tpu.memory_space<vmem>>, vector<8x128xf32>
    %cst_18 = arith.constant dense<0.000000e+00> : vector<2x128xf32>
    %25 = tpu.matmul %23, %24, %cst_18 {dimension_numbers = #tpu.dot_dimension_numbers<[1], [0], [0], [1], [0, 0, 1, 1], [], []>} : vector<2x8xf32>, vector<8x128xf32>, vector<2x128xf32> -> vector<2x128xf32>
    %26 = vector.shape_cast %25 : vector<2x128xf32> to vector<2x1x128xf32>
    %27 = vector.broadcast %26 : vector<2x1x128xf32> to vector<2x16x128xf32>
    %28 = arith.subf %18, %27 : vector<2x16x128xf32>
    %29 = arith.mulf %28, %28 : vector<2x16x128xf32>
    %cst_19 = arith.constant dense<0.000000e+00> : vector<2x128xf32>
    %30 = vector.multi_reduction <add>, %29, %cst_19 [1] : vector<2x16x128xf32> to vector<2x128xf32>
    %c0_20 = arith.constant 0 : index
    %c0_21 = arith.constant 0 : index
    %31 = vector.load %arg3[%c0_20, %c0_21] : memref<128x8xf32, #tpu.memory_space<vmem>>, vector<128x8xf32>
    %cst_22 = arith.constant dense<0.000000e+00> : vector<2x8xf32>
    %32 = tpu.matmul %30, %31, %cst_22 {dimension_numbers = #tpu.dot_dimension_numbers<[1], [0], [0], [1], [0, 0, 1, 1], [], []>} : vector<2x128xf32>, vector<128x8xf32>, vector<2x8xf32> -> vector<2x8xf32>
    %cst_23 = arith.constant 2.560000e+02 : f32
    %33 = vector.broadcast %cst_23 : f32 to vector<2x8xf32>
    %34 = arith.divf %32, %33 : vector<2x8xf32>
    %cst_24 = arith.constant 9.99999974E-6 : f32
    %35 = vector.broadcast %cst_24 : f32 to vector<2x8xf32>
    %36 = arith.addf %34, %35 : vector<2x8xf32>
    %37 = math.rsqrt %36 : vector<2x8xf32>
    %c0_25 = arith.constant 0 : index
    %c0_26 = arith.constant 0 : index
    %38 = vector.load %arg4[%c0_25, %c0_26] : memref<8x128xf32, #tpu.memory_space<vmem>>, vector<8x128xf32>
    %cst_27 = arith.constant dense<0.000000e+00> : vector<2x128xf32>
    %39 = tpu.matmul %37, %38, %cst_27 {dimension_numbers = #tpu.dot_dimension_numbers<[1], [0], [0], [1], [0, 0, 1, 1], [], []>} : vector<2x8xf32>, vector<8x128xf32>, vector<2x128xf32> -> vector<2x128xf32>
    %40 = vector.shape_cast %39 : vector<2x128xf32> to vector<2x1x128xf32>
    %41 = vector.broadcast %40 : vector<2x1x128xf32> to vector<2x16x128xf32>
    %42 = arith.mulf %28, %41 : vector<2x16x128xf32>
    %cst_28 = arith.constant 0.000000e+00 : f32
    %43 = vector.broadcast %cst_28 : f32 to vector<2x16x128xf32>
    %44 = arith.maximumf %42, %43 : vector<2x16x128xf32>
    %45 = vector.shape_cast %44 : vector<2x16x128xf32> to vector<32x128xf32>
    %c0_29 = arith.constant 0 : index
    %c0_30 = arith.constant 0 : index
    %46 = vector.load %arg5[%c0_29, %c0_30] : memref<16x32xf32, #tpu.memory_space<vmem>>, vector<16x32xf32>
    %cst_31 = arith.constant dense<0.000000e+00> : vector<16x128xf32>
    %47 = tpu.matmul %46, %45, %cst_31 {dimension_numbers = #tpu.dot_dimension_numbers<[1], [0], [0], [1], [0, 0, 1, 1], [], []>} : vector<16x32xf32>, vector<32x128xf32>, vector<16x128xf32> -> vector<16x128xf32>
    %c0_32 = arith.constant 0 : index
    %c0_33 = arith.constant 0 : index
    %48 = vector.load %arg6[%c0_32, %c0_33] : memref<16x32xf32, #tpu.memory_space<vmem>>, vector<16x32xf32>
    %cst_34 = arith.constant dense<0.000000e+00> : vector<16x128xf32>
    %49 = tpu.matmul %48, %45, %cst_34 {dimension_numbers = #tpu.dot_dimension_numbers<[1], [0], [0], [1], [0, 0, 1, 1], [], []>} : vector<16x32xf32>, vector<32x128xf32>, vector<16x128xf32> -> vector<16x128xf32>
    %50 = arith.maximumf %47, %49 : vector<16x128xf32>
    %c120_i32 = arith.constant 120 : i32
    %51 = tpu.dynamic_rotate %50 by %c120_i32 dim 1 : vector<16x128xf32>, i32 -> vector<16x128xf32>
    %52 = arith.maximumf %50, %51 : vector<16x128xf32>
    %c0_35 = arith.constant 0 : index
    %c0_36 = arith.constant 0 : index
    %53 = vector.load %arg7[%c0_35, %c0_36] : memref<128x64xf32, #tpu.memory_space<vmem>>, vector<128x64xf32>
    %cst_37 = arith.constant dense<0.000000e+00> : vector<16x64xf32>
    %54 = tpu.matmul %52, %53, %cst_37 {dimension_numbers = #tpu.dot_dimension_numbers<[1], [0], [0], [1], [0, 0, 1, 1], [], []>} : vector<16x128xf32>, vector<128x64xf32>, vector<16x64xf32> -> vector<16x64xf32>
    %55 = vector.shape_cast %54 : vector<16x64xf32> to vector<2x8x64xf32>
    %c0_38 = arith.constant 0 : index
    %c0_39 = arith.constant 0 : index
    %c0_40 = arith.constant 0 : index
    %56 = vector.load %arg8[%c0_38, %c0_39, %c0_40] : memref<2x8x64xf32, #tpu.memory_space<vmem>>, vector<2x8x64xf32>
    tpu.vector_store %arg8[%c0_38, %c0_39, %c0_40], %55 {strides = array<i32>} : memref<2x8x64xf32, #tpu.memory_space<vmem>>, vector<2x8x64xf32>,
    return
  }
  func.func @transform_0(%arg0: i32) -> (i32, i32, i32) {
    %c0_i32 = arith.constant 0 : i32
    %c0_i32_0 = arith.constant 0 : i32
    %c0_i32_1 = arith.constant 0 : i32
    return %arg0, %c0_i32, %c0_i32_0 : i32, i32, i32
  }
  func.func @transform_1(%arg0: i32) -> (i32, i32, i32) {
    %c0_i32 = arith.constant 0 : i32
    %c0_i32_0 = arith.constant 0 : i32
    %c0_i32_1 = arith.constant 0 : i32
    %c0_i32_2 = arith.constant 0 : i32
    return %c0_i32, %c0_i32_0, %c0_i32_1 : i32, i32, i32
  }
  func.func @transform_2(%arg0: i32) -> (i32, i32) {
    %c0_i32 = arith.constant 0 : i32
    %c0_i32_0 = arith.constant 0 : i32
    %c0_i32_1 = arith.constant 0 : i32
    return %c0_i32, %c0_i32_0 : i32, i32
  }
  func.func @transform_3(%arg0: i32) -> (i32, i32) {
    %c0_i32 = arith.constant 0 : i32
    %c0_i32_0 = arith.constant 0 : i32
    %c0_i32_1 = arith.constant 0 : i32
    return %c0_i32, %c0_i32_0 : i32, i32
  }
  func.func @transform_4(%arg0: i32) -> (i32, i32) {
    %c0_i32 = arith.constant 0 : i32
    %c0_i32_0 = arith.constant 0 : i32
    %c0_i32_1 = arith.constant 0 : i32
    return %c0_i32, %c0_i32_0 : i32, i32
  }
  func.func @transform_5(%arg0: i32) -> (i32, i32) {
    %c0_i32 = arith.constant 0 : i32
    %c0_i32_0 = arith.constant 0 : i32
    %c0_i32_1 = arith.constant 0 : i32
    return %c0_i32, %c0_i32_0 : i32, i32
  }
  func.func @transform_6(%arg0: i32) -> (i32, i32) {
    %c0_i32 = arith.constant 0 : i32
    %c0_i32_0 = arith.constant 0 : i32
    %c0_i32_1 = arith.constant 0 : i32
    return %c0_i32, %c0_i32_0 : i32, i32
  }
  func.func @transform_7(%arg0: i32) -> (i32, i32, i32) {
    %c0_i32 = arith.constant 0 : i32
    %c0_i32_0 = arith.constant 0 : i32
    %c0_i32_1 = arith.constant 0 : i32
    return %arg0, %c0_i32, %c0_i32_0 : i32, i32, i32
  }
}

module attributes {stable_mosaic.version = 11 : i64} {
  func.func @_vgg_block_kernel(%arg0: i32, %arg1: memref<2x18x72xbf16, #tpu.memory_space<vmem>>, %arg2: memref<3x72x128xbf16, #tpu.memory_space<vmem>>, %arg3: memref<128x8xf32, #tpu.memory_space<vmem>>, %arg4: memref<8x128xf32, #tpu.memory_space<vmem>>, %arg5: memref<16x32xf32, #tpu.memory_space<vmem>>, %arg6: memref<16x32xf32, #tpu.memory_space<vmem>>, %arg7: memref<128x64xf32, #tpu.memory_space<vmem>>, %arg8: memref<2x8x64xf32, #tpu.memory_space<vmem>>) attributes {dimension_semantics = [#tpu.dimension_semantics<parallel>], iteration_bounds = array<i64: 2>, scalar_prefetch = 0 : i64, scratch_operands = 0 : i64, tpu.core_type = #tpu.core_type<tc>, window_params = [{transform_indices = @transform_0, window_bounds = array<i64: 2, 18, 72>}, {pipeline_mode = #tpu.pipeline_mode<synchronous>, transform_indices = @transform_1, window_bounds = array<i64: 3, 72, 128>}, {pipeline_mode = #tpu.pipeline_mode<synchronous>, transform_indices = @transform_2, window_bounds = array<i64: 128, 8>}, {pipeline_mode = #tpu.pipeline_mode<synchronous>, transform_indices = @transform_3, window_bounds = array<i64: 8, 128>}, {pipeline_mode = #tpu.pipeline_mode<synchronous>, transform_indices = @transform_4, window_bounds = array<i64: 16, 32>}, {pipeline_mode = #tpu.pipeline_mode<synchronous>, transform_indices = @transform_5, window_bounds = array<i64: 16, 32>}, {pipeline_mode = #tpu.pipeline_mode<synchronous>, transform_indices = @transform_6, window_bounds = array<i64: 128, 64>}, {transform_indices = @transform_7, window_bounds = array<i64: 2, 8, 64>}]} {
    %c0 = arith.constant 0 : index
    %c0_0 = arith.constant 0 : index
    %c0_1 = arith.constant 0 : index
    %0 = vector.load %arg1[%c0, %c0_0, %c0_1] : memref<2x18x72xbf16, #tpu.memory_space<vmem>>, vector<2x18x72xbf16>
    %1 = vector.extract_strided_slice %0 {offsets = [0, 0, 0], sizes = [2, 16, 72], strides = [1, 1, 1]} : vector<2x18x72xbf16> to vector<2x16x72xbf16>
    %2 = vector.shape_cast %1 : vector<2x16x72xbf16> to vector<32x72xbf16>
    %c0_2 = arith.constant 0 : index
    %c0_3 = arith.constant 0 : index
    %c0_4 = arith.constant 0 : index
    %3 = vector.load %arg2[%c0_2, %c0_3, %c0_4] : memref<3x72x128xbf16, #tpu.memory_space<vmem>>, vector<1x72x128xbf16>
    %4 = vector.shape_cast %3 : vector<1x72x128xbf16> to vector<72x128xbf16>
    %cst = arith.constant dense<0.000000e+00> : vector<32x128xf32>
    %5 = tpu.matmul %2, %4, %cst {dimension_numbers = #tpu.dot_dimension_numbers<[1], [0], [0], [1], [0, 0, 1, 1], [], []>} : vector<32x72xbf16>, vector<72x128xbf16>, vector<32x128xf32> -> vector<32x128xf32>
    %6 = vector.extract_strided_slice %0 {offsets = [0, 1, 0], sizes = [2, 16, 72], strides = [1, 1, 1]} : vector<2x18x72xbf16> to vector<2x16x72xbf16>
    %7 = vector.shape_cast %6 : vector<2x16x72xbf16> to vector<32x72xbf16>
    %c1 = arith.constant 1 : index
    %c0_5 = arith.constant 0 : index
    %c0_6 = arith.constant 0 : index
    %8 = vector.load %arg2[%c1, %c0_5, %c0_6] : memref<3x72x128xbf16, #tpu.memory_space<vmem>>, vector<1x72x128xbf16>
    %9 = vector.shape_cast %8 : vector<1x72x128xbf16> to vector<72x128xbf16>
    %cst_7 = arith.constant dense<0.000000e+00> : vector<32x128xf32>
    %10 = tpu.matmul %7, %9, %cst_7 {dimension_numbers = #tpu.dot_dimension_numbers<[1], [0], [0], [1], [0, 0, 1, 1], [], []>} : vector<32x72xbf16>, vector<72x128xbf16>, vector<32x128xf32> -> vector<32x128xf32>
    %11 = arith.addf %5, %10 : vector<32x128xf32>
    %12 = vector.extract_strided_slice %0 {offsets = [0, 2, 0], sizes = [2, 16, 72], strides = [1, 1, 1]} : vector<2x18x72xbf16> to vector<2x16x72xbf16>
    %13 = vector.shape_cast %12 : vector<2x16x72xbf16> to vector<32x72xbf16>
    %c2 = arith.constant 2 : index
    %c0_8 = arith.constant 0 : index
    %c0_9 = arith.constant 0 : index
    %14 = vector.load %arg2[%c2, %c0_8, %c0_9] : memref<3x72x128xbf16, #tpu.memory_space<vmem>>, vector<1x72x128xbf16>
    %15 = vector.shape_cast %14 : vector<1x72x128xbf16> to vector<72x128xbf16>
    %cst_10 = arith.constant dense<0.000000e+00> : vector<32x128xf32>
    %16 = tpu.matmul %13, %15, %cst_10 {dimension_numbers = #tpu.dot_dimension_numbers<[1], [0], [0], [1], [0, 0, 1, 1], [], []>} : vector<32x72xbf16>, vector<72x128xbf16>, vector<32x128xf32> -> vector<32x128xf32>
    %17 = arith.addf %11, %16 : vector<32x128xf32>
    %18 = vector.shape_cast %17 : vector<32x128xf32> to vector<2x16x128xf32>
    %cst_11 = arith.constant dense<0.000000e+00> : vector<2x128xf32>
    %19 = vector.multi_reduction <add>, %18, %cst_11 [1] : vector<2x16x128xf32> to vector<2x128xf32>
    %c0_12 = arith.constant 0 : index
    %c0_13 = arith.constant 0 : index
    %20 = vector.load %arg3[%c0_12, %c0_13] : memref<128x8xf32, #tpu.memory_space<vmem>>, vector<128x8xf32>
    %cst_14 = arith.constant dense<0.000000e+00> : vector<2x8xf32>
    %21 = tpu.matmul %19, %20, %cst_14 {dimension_numbers = #tpu.dot_dimension_numbers<[1], [0], [0], [1], [0, 0, 1, 1], [], []>} : vector<2x128xf32>, vector<128x8xf32>, vector<2x8xf32> -> vector<2x8xf32>
    %cst_15 = arith.constant 2.560000e+02 : f32
    %22 = vector.broadcast %cst_15 : f32 to vector<2x8xf32>
    %23 = arith.divf %21, %22 : vector<2x8xf32>
    %c0_16 = arith.constant 0 : index
    %c0_17 = arith.constant 0 : index
    %24 = vector.load %arg4[%c0_16, %c0_17] : memref<8x128xf32, #tpu.memory_space<vmem>>, vector<8x128xf32>
    %cst_18 = arith.constant dense<0.000000e+00> : vector<2x128xf32>
    %25 = tpu.matmul %23, %24, %cst_18 {dimension_numbers = #tpu.dot_dimension_numbers<[1], [0], [0], [1], [0, 0, 1, 1], [], []>} : vector<2x8xf32>, vector<8x128xf32>, vector<2x128xf32> -> vector<2x128xf32>
    %26 = vector.shape_cast %25 : vector<2x128xf32> to vector<2x1x128xf32>
    %27 = vector.broadcast %26 : vector<2x1x128xf32> to vector<2x16x128xf32>
    %28 = arith.subf %18, %27 : vector<2x16x128xf32>
    %29 = arith.mulf %28, %28 : vector<2x16x128xf32>
    %cst_19 = arith.constant dense<0.000000e+00> : vector<2x128xf32>
    %30 = vector.multi_reduction <add>, %29, %cst_19 [1] : vector<2x16x128xf32> to vector<2x128xf32>
    %c0_20 = arith.constant 0 : index
    %c0_21 = arith.constant 0 : index
    %31 = vector.load %arg3[%c0_20, %c0_21] : memref<128x8xf32, #tpu.memory_space<vmem>>, vector<128x8xf32>
    %cst_22 = arith.constant dense<0.000000e+00> : vector<2x8xf32>
    %32 = tpu.matmul %30, %31, %cst_22 {dimension_numbers = #tpu.dot_dimension_numbers<[1], [0], [0], [1], [0, 0, 1, 1], [], []>} : vector<2x128xf32>, vector<128x8xf32>, vector<2x8xf32> -> vector<2x8xf32>
    %cst_23 = arith.constant 2.560000e+02 : f32
    %33 = vector.broadcast %cst_23 : f32 to vector<2x8xf32>
    %34 = arith.divf %32, %33 : vector<2x8xf32>
    %cst_24 = arith.constant 9.99999974E-6 : f32
    %35 = vector.broadcast %cst_24 : f32 to vector<2x8xf32>
    %36 = arith.addf %34, %35 : vector<2x8xf32>
    %37 = math.rsqrt %36 : vector<2x8xf32>
    %c0_25 = arith.constant 0 : index
    %c0_26 = arith.constant 0 : index
    %38 = vector.load %arg4[%c0_25, %c0_26] : memref<8x128xf32, #tpu.memory_space<vmem>>, vector<8x128xf32>
    %cst_27 = arith.constant dense<0.000000e+00> : vector<2x128xf32>
    %39 = tpu.matmul %37, %38, %cst_27 {dimension_numbers = #tpu.dot_dimension_numbers<[1], [0], [0], [1], [0, 0, 1, 1], [], []>} : vector<2x8xf32>, vector<8x128xf32>, vector<2x128xf32> -> vector<2x128xf32>
    %40 = vector.shape_cast %39 : vector<2x128xf32> to vector<2x1x128xf32>
    %41 = vector.broadcast %40 : vector<2x1x128xf32> to vector<2x16x128xf32>
    %42 = arith.mulf %28, %41 : vector<2x16x128xf32>
    %cst_28 = arith.constant 0.000000e+00 : f32
    %43 = vector.broadcast %cst_28 : f32 to vector<2x16x128xf32>
    %44 = arith.maximumf %42, %43 : vector<2x16x128xf32>
    %45 = vector.shape_cast %44 : vector<2x16x128xf32> to vector<32x128xf32>
    %c0_29 = arith.constant 0 : index
    %c0_30 = arith.constant 0 : index
    %46 = vector.load %arg5[%c0_29, %c0_30] : memref<16x32xf32, #tpu.memory_space<vmem>>, vector<16x32xf32>
    %cst_31 = arith.constant dense<0.000000e+00> : vector<16x128xf32>
    %47 = tpu.matmul %46, %45, %cst_31 {dimension_numbers = #tpu.dot_dimension_numbers<[1], [0], [0], [1], [0, 0, 1, 1], [], []>} : vector<16x32xf32>, vector<32x128xf32>, vector<16x128xf32> -> vector<16x128xf32>
    %c0_32 = arith.constant 0 : index
    %c0_33 = arith.constant 0 : index
    %48 = vector.load %arg6[%c0_32, %c0_33] : memref<16x32xf32, #tpu.memory_space<vmem>>, vector<16x32xf32>
    %cst_34 = arith.constant dense<0.000000e+00> : vector<16x128xf32>
    %49 = tpu.matmul %48, %45, %cst_34 {dimension_numbers = #tpu.dot_dimension_numbers<[1], [0], [0], [1], [0, 0, 1, 1], [], []>} : vector<16x32xf32>, vector<32x128xf32>, vector<16x128xf32> -> vector<16x128xf32>
    %50 = arith.maximumf %47, %49 : vector<16x128xf32>
    %c120_i32 = arith.constant 120 : i32
    %51 = tpu.dynamic_rotate %50 by %c120_i32 dim 1 : vector<16x128xf32>, i32 -> vector<16x128xf32>
    %52 = arith.maximumf %50, %51 : vector<16x128xf32>
    %c0_35 = arith.constant 0 : index
    %c0_36 = arith.constant 0 : index
    %53 = vector.load %arg7[%c0_35, %c0_36] : memref<128x64xf32, #tpu.memory_space<vmem>>, vector<128x64xf32>
    %cst_37 = arith.constant dense<0.000000e+00> : vector<16x64xf32>
    %54 = tpu.matmul %52, %53, %cst_37 {dimension_numbers = #tpu.dot_dimension_numbers<[1], [0], [0], [1], [0, 0, 1, 1], [], []>} : vector<16x128xf32>, vector<128x64xf32>, vector<16x64xf32> -> vector<16x64xf32>
    %55 = vector.shape_cast %54 : vector<16x64xf32> to vector<2x8x64xf32>
    %c0_38 = arith.constant 0 : index
    %c0_39 = arith.constant 0 : index
    %c0_40 = arith.constant 0 : index
    %56 = vector.load %arg8[%c0_38, %c0_39, %c0_40] : memref<2x8x64xf32, #tpu.memory_space<vmem>>, vector<2x8x64xf32>
    tpu.vector_store %arg8[%c0_38, %c0_39, %c0_40], %55 {strides = array<i32>} : memref<2x8x64xf32, #tpu.memory_space<vmem>>, vector<2x8x64xf32>,
    return
  }
  func.func @transform_0(%arg0: i32) -> (i32, i32, i32) {
    %c0_i32 = arith.constant 0 : i32
    %c0_i32_0 = arith.constant 0 : i32
    %c0_i32_1 = arith.constant 0 : i32
    return %arg0, %c0_i32, %c0_i32_0 : i32, i32, i32
  }
  func.func @transform_1(%arg0: i32) -> (i32, i32, i32) {
    %c0_i32 = arith.constant 0 : i32
    %c0_i32_0 = arith.constant 0 : i32
    %c0_i32_1 = arith.constant 0 : i32
    %c0_i32_2 = arith.constant 0 : i32
    return %c0_i32, %c0_i32_0, %c0_i32_1 : i32, i32, i32
  }
  func.func @transform_2(%arg0: i32) -> (i32, i32) {
    %c0_i32 = arith.constant 0 : i32
    %c0_i32_0 = arith.constant 0 : i32
    %c0_i32_1 = arith.constant 0 : i32
    return %c0_i32, %c0_i32_0 : i32, i32
  }
  func.func @transform_3(%arg0: i32) -> (i32, i32) {
    %c0_i32 = arith.constant 0 : i32
    %c0_i32_0 = arith.constant 0 : i32
    %c0_i32_1 = arith.constant 0 : i32
    return %c0_i32, %c0_i32_0 : i32, i32
  }
  func.func @transform_4(%arg0: i32) -> (i32, i32) {
    %c0_i32 = arith.constant 0 : i32
    %c0_i32_0 = arith.constant 0 : i32
    %c0_i32_1 = arith.constant 0 : i32
    return %c0_i32, %c0_i32_0 : i32, i32
  }
  func.func @transform_5(%arg0: i32) -> (i32, i32) {
    %c0_i32 = arith.constant 0 : i32
    %c0_i32_0 = arith.constant 0 : i32
    %c0_i32_1 = arith.constant 0 : i32
    return %c0_i32, %c0_i32_0 : i32, i32
  }
  func.func @transform_6(%arg0: i32) -> (i32, i32) {
    %c0_i32 = arith.constant 0 : i32
    %c0_i32_0 = arith.constant 0 : i32
    %c0_i32_1 = arith.constant 0 : i32
    return %c0_i32, %c0_i32_0 : i32, i32
  }
  func.func @transform_7(%arg0: i32) -> (i32, i32, i32) {
    %c0_i32 = arith.constant 0 : i32
    %c0_i32_0 = arith.constant 0 : i32
    %c0_i32_1 = arith.constant 0 : i32
    return %arg0, %c0_i32, %c0_i32_0 : i32, i32, i32
  }
}

</mosaic_0001>

<bundles_post_ra>
// kernel: tpu_custom_call.1
= control target key start
LH: loop header
LB: loop body
LE: loop exit
PB: predicated region body
PF: predicated region fallthrough
CT: control target
= control target key end

     0   :  { %12 = vsyncpa [#allocation3], 0  ;;  %s2439_s0 = inlined_call_operand.vmem [shape: bf16[4,18,72], index: 0, kind: input, shape index: {}]   ;;  %s2440_s1 = inlined_call_operand.vmem [shape: bf16[3,72,128], index: 1, kind: input, shape index: {}]   ;;  %s2441_s2 = inlined_call_operand.vmem [shape: f32[128,8], index: 2, kind: input, shape index: {}]   ;;  %s2442_s3 = inlined_call_operand.vmem [shape: f32[8,128], index: 3, kind: input, shape index: {}]   ;;  %s2443_s4 = inlined_call_operand.vmem [shape: f32[16,32], index: 4, kind: input, shape index: {}]   ;;  %s2444_s5 = inlined_call_operand.vmem [shape: f32[16,32], index: 5, kind: input, shape index: {}]   ;;  %s2445_s6 = inlined_call_operand.vmem [shape: f32[128,64], index: 6, kind: input, shape index: {}]   ;;  %s2446_s7 = inlined_call_operand.hbm [shape: f32[4,8,64], index: 7, kind: output, shape index: {}]  }
   0x1   :  { %14 = vsyncpa [#allocation3 + $0x1], 0  ;;  %s2069_s24 = smov 0   ;;  %s2071_s25 = smov 0  }
   0x2   :  { %s2073_s26 = smov 0   ;;  %s2075_s27 = smov 0  }
   0x3 LB: > { %s2090_s28 = sadd.s32 4294967295, %s2019_s27   ;;  %s1445_s29 = sadd.s32 4294967294, %s2019_s27   ;;  %s2019_s27 = sphi %s2075_s27, %s2456_s27   ;;  %s2015_s26 = sphi %s2073_s26, %s2455_s26   ;;  %s2011_s25 = sphi %s2071_s25, %s2454_s25   ;;  %s2007_s24 = sphi %s2069_s24, %s2453_s24  }
   0x4   : > { %s2094_s30 = sadd.s32 1, %s2019_s27   ;;  %s179_s8 = sadd.s32 1, %s2015_s26 }
   0x5   : > { %s176_s9 = ssub.s32 %s2019_s27, %s2094_s30  ;;  %p189_p0 = scmp.ne.s32.totalorder %s2015_s26, %s2011_s25 }
   0x6   : > { %p177_p1 = scmp.eq.s32.totalorder %s176_s9, 0  ;;  %p190_p2 = scmp.eq.s32.totalorder %s2090_s28, 1 }
   0x7   : > { %p195_p3 = scmp.ne.s32.totalorder %s2011_s25, %s2007_s24  ;;  %p196_p4 = scmp.eq.s32.totalorder %s1445_s29, 1 }
   0x8   : > { %s2105_s10 = scalar_select %p177_p1, %s2015_s26, %s179_s8  }
   0x9   : > { %p2107_p5 = por %p190_p2, %p189_p0  ;;  %p2111_p6 = por %p196_p4, %p195_p3 }
   0xa   : > { %p1448_p7 = scmp.ge.s32.totalorder %s2019_s27, 1  ;;  %p242_p8 = scmp.lt.s32.totalorder %s2019_s27, 3 }
   0xc   : > { %p243_p9 = pnand %p1448_p7, %p242_p8 }
   0xd   : > { %v1938_v0 = vld [vmem:[%s2440_s1] sm:$0xff] (!%p243_p9)   ;;  %v1939_v1 = vld [vmem:[%s2440_s1 + $0x8] sm:$0xff] (!%p243_p9)   ;;  %s1450_s17 = sshll.u32 (!%p243_p9), %s2090_s28, 1  ;;  %v1940_v2 = vld [vmem:[%s2440_s1 + $0x10] sm:$0xff] (!%p243_p9)   ;;  %vm400_vm0 = vcmask (!%p243_p9), 1043456   ;;  %vm393_vm1 = vcmask (!%p243_p9), 588800  }
   0xe   : > { %246 = sbr.rel (%p243_p9) target bundleno = 1763 (0x6e3), region = 48  ;;  %1614 = vmatprep.subr.bf16.mxu0 (!%p243_p9), %v1938_v0  ;;  %p276_p10 = scmp.lt.s32.totalorder (!%p243_p9), %s1450_s17, 3  ;;  %v1943_v3 = vld [vmem:[%s2440_s1 + $0x24] sm:$0xff] (!%p243_p9)   ;;  %v1942_v4 = vld [vmem:[%s2440_s1 + $0x20] ss:$0 sps:$4 sm:$0xff] (!%p243_p9)   ;;  %v1946_v5 = vld [vmem:[%s2440_s1 + $0x2c] sm:$0xff] (!%p243_p9)  }
   0xf   : > { %1615 = vmatpush3.bf16.msra.mxu0 (!%p243_p9), %v1938_v0  ;;  %1600 = vmatprep.subr.bf16.mxu1 (!%p243_p9), %v1943_v3  ;;  %v1941_v6 = vld [vmem:[%s2440_s1 + $0x18] sm:$0xff] (!%p243_p9)   ;;  %v497_v8 = vsel (!%p243_p9), %vm400_vm0, %v1942_v4, 0  ;;  %vm550_vm2 = vcmask (!%p243_p9), 1042432   ;;  %vm551_vm3 = vcmask (!%p243_p9), 1046532   ;;  %v1945_v23 = vld [vmem:[%s2440_s1 + $0x48] sm:$0xff] (!%p243_p9)   ;;  %v1948_v42 = vld [vmem:[%s2440_s1 + $0x50] sm:$0xff] (!%p243_p9)  }
  0x10   : > { %1616 = vmatprep.subr.bf16.mxu0 (!%p243_p9), %v1939_v1  ;;  %1601 = vmatpush3.bf16.msra.mxu1 (!%p243_p9), %v1943_v3  ;;  %v1949_v7 = vld [vmem:[%s2440_s1 + $0x34] sm:$0xff] (!%p243_p9)   ;;  %v1951_v21 = vld [vmem:[%s2440_s1 + $0x3c] sm:$0xff] (!%p243_p9)   ;;  %vm2168_vm4 = vmor (!%p243_p9), %vm550_vm2, %vm551_vm3  ;;  %vm299_vm5 = vsmask.f32 (!%p243_p9), 3328  ;;  %vm300_vm6 = vsmask.f32 (!%p243_p9), 7440 }
  0x11   : > { %1602 = vmatprep.subr.bf16.mxu1 (!%p243_p9), %v1946_v5  ;;  %v1953_v26 = vld [vmem:[%s2440_s1 + $0x44] ss:$0 sps:$4 sm:$0xff] (!%p243_p9)   ;;  %vm2189_vm7 = vmor (!%p243_p9), %vm299_vm5, %vm300_vm6  ;;  %v1950_v58 = vld [vmem:[%s2440_s1 + $0x58] sm:$0xff] (!%p243_p9)   ;;  %vm2022_vm8 = vmmov (!%p243_p9), 0   ;;  %vm704_vm9 = vcmask (!%p243_p9), 1041409   ;;  %vm780_vm10 = vcmask (!%p243_p9), 64512  }
  0x12   : > { %v402_v43 = vsel (!%p243_p9), %vm400_vm0, %v1953_v26, 0  ;;  %v686_v60 = vld [vmem:[%s2441_s2] sm:$0xff] (!%p243_p9)  ;;  %v687_v61 = vld [vmem:[%s2441_s2 + $0x8] sm:$0xff] (!%p243_p9)  ;;  %vm1102_vm11 = vcmask (!%p243_p9), 261120   ;;  %s272_s8 = sand.u32 (!%p243_p9), 1, %s2011_s25   ;;  %s1510_s15 = sshll.u32 (!%p243_p9), %s2090_s28, 8 }
  0x13   : > { %1617 = vmatpush3.bf16.msra.mxu0 (!%p243_p9), %v1939_v1  ;;  %v2021_v1 = vmov (!%p243_p9), 0.0|0.0   ;;  %v694_v25 = vld [vmem:[%s2441_s2 + $0x40] sm:$0xff] (!%p243_p9)  ;;  %s1449_s9 = sshll.u32 (!%p243_p9), %s272_s8, 4  ;;  %vm1366_vm12 = vcmask (!%p243_p9), 523264   ;;  %s2398_s19 = scalar_lea.sflag (!%p243_p9), [#allocation3], %s272_s8 }
  0x14   : > { %1618 = vmatprep.subr.bf16.mxu0 (!%p243_p9), %v1940_v2  ;;  %1603 = vmatpush3.bf16.msra.mxu1 (!%p243_p9), %v1946_v5  ;;  %v2217_v5 = vpack.c.bf16 (!%p243_p9), %v687_v61, %v686_v60  ;;  %s274_s13 = scalar_lea.vmem (!%p243_p9), [#allocation2], %s1449_s9  ;;  %s2026_s28 = smov (!%p243_p9), [#allocation2]  }
  0x15   : > { %s2458_s17 = smov (!%p276_p10, %s1450_s17), 3  ;;  %1604 = vmatprep.subr.bf16.mxu1 %v1949_v7  ;;  %s1383_s14 = sshll.u32 %s274_s13, 4  ;;  %s2391_s14 = int_to_ptr.vmem [resolvable:$true] %s1383_s14 }
  0x16   : > { %s1886_s29 = smul.u32 12, %s2458_s17  ;;  %s2396_s17 = scalar_lea.hbm %s2446_s7, %s1510_s15 }
  0x17   : > { %1619 = vmatpush3.bf16.msra.mxu0 %v1940_v2  ;;  %s1957_s20 = scalar_lea.vmem %s2391_s14, 256  ;;  %s1961_s21 = sshll.u32 %s2026_s28, 4  ;;  %s1962_s21 = int_to_ptr.vmem [resolvable:$false] %s1961_s21 }
  0x18   : > { %s2142_s18 = scalar_lea.vmem %s2439_s0, %s1886_s29  ;;  %1620 = vmatprep.subr.bf16.mxu0 %v1941_v6  ;;  %1605 = vmatpush3.bf16.msra.mxu1 %v1949_v7  ;;  %s2025_s29 = smov 120  }
  0x19   : > { %v284_v9 = vld [vmem:[%s2142_s18] sm:$0xf]  ;;  %v285_v10 = vld [vmem:[%s2142_s18 + $0x4] sm:$0xf]  ;;  %v2151_v14 = vld [vmem:[%s2142_s18 + $0xc] sm:$0xf]  ;;  %1606 = vmatprep.subr.bf16.mxu1 %v1951_v21  ;;  %p1958_p11 = scmp.ne.s32.totalorder %s2391_s14, %s1957_s20  ;;  %p1964_p0 = scmp.lt.s32.totalorder %s2391_s14, %s1962_s21 }
  0x1a   : > { %v303_v11 = vshrl.u32 %v284_v9, 16  ;;  %v306_v12 = vshll.u32 %v284_v9, 16  ;;  %v1470_v13 = vcombine.low %v284_v9, %v285_v10  ;;  %v316_v15 = vshrl.u32 %v285_v10, 16  ;;  %v2154_v17 = vld [vmem:[%s2142_s18 + $0x10] sm:$0xf]  ;;  %s1963_s22 = scalar_lea.vmem %s1962_s21, 512 }
  0x1b   : > { %v555_v16 = vrot.slane %v285_v10, 5  ;;  %v1479_v18 = vrot.slane %v284_v9, 9  ;;  %v327_v19 = vshrl.u32 %v2151_v14, 16  ;;  %v330_v20 = vshll.u32 %v2151_v14, 16  ;;  %1621 = vmatpush3.bf16.msra.mxu0 %v1941_v6  ;;  %v286_v28 = vld [vmem:[%s2142_s18 + $0x8] sm:$0x1]  ;;  %p1959_p12 = pnand %p1958_p11, %p2107_p5  ;;  %p1965_p1 = scmp.lt.s32.totalorder %s1963_s22, %s1957_s20 }
  0x1c   : > { %1624 = vmatprep.mubr.msk.bf16.mxu0 %vm393_vm1, %v1470_v13  ;;  %v340_v24 = vshrl.u32 %v2154_v17, 16  ;;  %1884 = vmatprep.subr.msk.bf16.mxu0 %vm400_vm0, %v1942_v4  ;;  %v1471_v27 = vcombine.low %v2151_v14, %v2154_v17  ;;  %v305_v29 = vrot.slane %v303_v11, 4  ;;  %v308_v30 = vrot.slane %v306_v12, 5  ;;  %v289_v39 = vld [vmem:[%s2142_s18 + $0x14] sm:$0x1]  ;;  %v1952_v6 = vld [vmem:[%s2440_s1 + $0x60] sm:$0xff]  }
  0x1d   : > { %v557_v22 = vrot.slane %v555_v16, 4  ;;  %v312_v31 = vshll.u32 %v285_v10, 16  ;;  %v556_v32 = vsel %vm2168_vm4, %v1479_v18, %v555_v16  ;;  %v318_v33 = vrot.slane %v316_v15, 4  ;;  %1607 = vmatpush3.bf16.msra.mxu1 %v1951_v21  ;;  %v689_v9 = vld [vmem:[%s2441_s2 + $0x18] sm:$0xff]  ;;  %v1954_v15 = vld [vmem:[%s2440_s1 + $0x68] ss:$0 sps:$4 sm:$0xff]   ;;  %p1960_p13 = pneg %p1959_p12  ;;  %p1966_p2 = por %p1965_p1, %p1964_p0 }
  0x1e   : > { %v322_v34 = vshll.u32 %v286_v28, 16  ;;  %v558_v35 = vrot.slane %v286_v28, 5  ;;  %v329_v36 = vrot.slane %v327_v19, 4  ;;  %v309_v37 = vor.u32 %v308_v30, %v305_v29  ;;  %1883 = vmatprep.subr.msk.bf16.mxu1 %vm400_vm0, %v1953_v26  ;;  %v690_v19 = vld [vmem:[%s2441_s2 + $0x20] sm:$0xff]  ;;  %v695_v26 = vld [vmem:[%s2441_s2 + $0x48] sm:$0xff]  ;;  %v696_v28 = vld [vmem:[%s2441_s2 + $0x50] sm:$0xff] }
  0x1f   : > { %1623 = vmatpush3.bf16.msra.mxu0 %v497_v8  ;;  %v314_v38 = vrot.slane %v312_v31, 5  ;;  %v332_v40 = vrot.slane %v330_v20, 5  ;;  %v336_v41 = vshll.u32 %v2154_v17, 16  ;;  %v342_v46 = vrot.slane %v340_v24, 4  ;;  %v688_v8 = vld [vmem:[%s2441_s2 + $0x10] sm:$0xff]  ;;  %v691_v20 = vld [vmem:[%s2441_s2 + $0x28] sm:$0xff]  ;;  %p1967_p3 = pnand %p1966_p2, %p1960_p13 }
  0x20   : > { %1628 = vmatprep.subr.bf16.mxu0 %v1945_v23  ;;  %v324_v45 = vrot.slane %v322_v34, 5  ;;  %v346_v47 = vshll.u32 %v289_v39, 16  ;;  %v310_v48 = vrot.slane %v309_v37, 4  ;;  %v559_v53 = vsel %vm2168_vm4, %v557_v22, %v558_v35  ;;  %v692_v22 = vld [vmem:[%s2441_s2 + $0x30] sm:$0xff]  ;;  %v697_v29 = vld [vmem:[%s2441_s2 + $0x58] sm:$0xff]  ;;  %v698_v31 = vld [vmem:[%s2441_s2 + $0x60] sm:$0xff] }
  0x21   : > { %v319_v49 = vor.u32 %v318_v33, %v314_v38  ;;  %v333_v50 = vor.u32 %v332_v40, %v329_v36  ;;  %v338_v51 = vrot.slane %v336_v41, 5  ;;  %1609 = vmatpush3.bf16.msra.mxu1 %v402_v43  ;;  %v1490_v59 = vcombine.low %v556_v32, %v559_v53  ;;  %v699_v32 = vld [vmem:[%s2441_s2 + $0x68] sm:$0xff]  ;;  %v700_v34 = vld [vmem:[%s2441_s2 + $0x70] sm:$0xff]  ;;  %v701_v35 = vld [vmem:[%s2441_s2 + $0x78] sm:$0xff] }
  0x22   : > { %1625 = vmatmul.mubr.msk.bf16.vlgmr.msra.gmra.mrb[0].mxu0 %vm393_vm1, %v1471_v27  ;;  %v348_v52 = vrot.slane %v346_v47, 5  ;;  %v315_v54 = vsel %vm2189_vm7, %v310_v48, %v314_v38  ;;  %1779 = vmatprep.subr.bf16.mxu1 %v2021_v1  ;;  %v562_v3 = vrot.slane %v2154_v17, 5  ;;  %v1480_v10 = vrot.slane %v2151_v14, 9  ;;  %v779_v38 = vld [vmem:[%s2442_s3] sm:$0xff] }
  0x23   : > { %1629 = vmatpush3.bf16.msra.mxu0 %v1945_v23  ;;  %v320_v55 = vrot.slane %v319_v49, 4  ;;  %v334_v56 = vrot.slane %v333_v50, 4  ;;  %v343_v57 = vor.u32 %v342_v46, %v338_v51  ;;  %1638 = vmatprep.mubr.msk.bf16.mxu0 %vm393_vm1, %v1490_v59  ;;  %v565_v11 = vrot.slane %v289_v39, 5  ;;  %v693_v23 = vld [vmem:[%s2441_s2 + $0x38] sm:$0xff] }
  0x24   : > { %1630 = vmatprep.subr.bf16.mxu0 %v1948_v42  ;;  %v564_v12 = vrot.slane %v562_v3, 4  ;;  %v2232_v13 = vpack.c.bf16 %v689_v9, %v688_v8  ;;  %v563_v16 = vsel %vm2168_vm4, %v1480_v10, %v562_v3  ;;  %v617_v17 = vsel %vm400_vm0, %v1954_v15, 0 }
  0x25   : > { %v325_v62 = vsel %vm2189_vm7, %v320_v55, %v324_v45  ;;  %v339_v63 = vsel %vm2189_vm7, %v334_v56, %v338_v51  ;;  %v344_v0 = vrot.slane %v343_v57, 4  ;;  %v2253_v21 = vpack.c.bf16 %v691_v20, %v690_v19 }
  0x26   : > { %v1461_v2 = vcombine.low %v315_v54, %v325_v62  ;;  %v566_v14 = vsel %vm2168_vm4, %v564_v12, %v565_v11  ;;  %v2263_v24 = vpack.c.bf16 %v693_v23, %v692_v22  ;;  %v2273_v27 = vpack.c.bf16 %v695_v26, %v694_v25 }
  0x27   : > { %1631 = vmatpush3.bf16.msra.mxu0 %v1948_v42  ;;  %v349_v4 = vsel %vm2189_vm7, %v344_v0, %v348_v52  ;;  %v1491_v18 = vcombine.low %v563_v16, %v566_v14  ;;  %v1795_v30 = vpack.c.bf16 %v697_v29, %v696_v28  ;;  %v1798_v33 = vpack.c.bf16 %v699_v32, %v698_v31 }
  0x28   : > { %1632 = vmatprep.subr.bf16.mxu0 %v1950_v58  ;;  %1610 = vmatprep.mubr.msk.bf16.mxu1 %vm393_vm1, %v1461_v2  ;;  %v1462_v7 = vcombine.low %v339_v63, %v349_v4  ;;  %v1801_v36 = vpack.c.bf16 %v701_v35, %v700_v34  ;;  %v2023_v37 = vmov 0.0   ;;  %v858_v8 = vlaneseq }
  0x2a   : > { %1611 = vmatmul.mubr.msk.bf16.vlgmr.msra.gmra.mrb[0].mxu1 %vm393_vm1, %v1462_v7  ;;  %v859_v10 = vshrl.u32 %v858_v8, 7  ;;  %v1276_v8 = vld [vmem:[%s2445_s6 + $0x8] sm:$0xff] }
  0x2b   : > { %1633 = vmatpush3.bf16.msra.mxu0 %v1950_v58  ;;  %1781 = vmatpush3.bf16.msra.mxu1 %v2217_v5 }
  0x2c   : > { %1634 = vmatprep.subr.bf16.mxu0 %v1952_v6  ;;  %1782 = vmatprep.subr.bf16.mxu1 %v2021_v1 }
  0x2d   : > { %1674 = vmatprep.mubr.msk.f32.mxu1 %vm2022_vm8, %v2023_v37 }
  0x2f   : > { %1635 = vmatpush3.bf16.msra.mxu0 %v1952_v6  ;;  %1784 = vmatpush3.bf16.msra.mxu1 %v2232_v13  ;;  %v2024_v6 = vmov 1966171168  }
  0x30   : > { %1885 = vmatprep.subr.msk.bf16.mxu0 %vm400_vm0, %v1954_v15  ;;  %1785 = vmatprep.subr.bf16.mxu1 %v2021_v1  ;;  %v856_v7 = vunpack.c.l.s4 %v2024_v6  ;;  %v879_v15 = vsub.s32 0, %v859_v10  ;;  %v1185_v6 = vld [vmem:[%s2444_s5 + $0x8] sm:$0xff] }
  0x32   : > { %v857_v9 = vunpack.c.0.s8 %v856_v7  ;;  %v1275_v7 = vld [vmem:[%s2445_s6] sm:$0xff] }
  0x33   : > { %1637 = vmatpush3.bf16.msra.mxu0 %v617_v17  ;;  %1787 = vmatpush3.bf16.msra.mxu1 %v2253_v21 }
  0x34   : > { %1788 = vmatprep.subr.bf16.mxu1 %v2021_v1  ;;  %1677 = vmatprep.subr.mxu0 %v2023_v37  ;;  %v860_v11 = vsub.s32 %v857_v9, %v859_v10  ;;  %v1277_v9 = vld [vmem:[%s2445_s6 + $0x10] sm:$0xff]  ;;  %v1843_v10 = vpack.c.bf16 %v1276_v8, %v1275_v7 }
  0x36   : > { %1639 = vmatmul.mubr.msk.bf16.vlgmr.msra.gmra.mrb[0].mxu0 %vm393_vm1, %v1491_v18 }
  0x37   : > { %1790 = vmatpush3.bf16.msra.mxu1 %v2263_v24  ;;  %1679 = vmatprep.mubr.msk.f32.mxu0 %vm2022_vm8, %v2023_v37 }
  0x38   : > { %1791 = vmatprep.subr.bf16.mxu1 %v2021_v1  ;;  %1678 = vmatpush3.msra.mxu0 %v779_v38 }
  0x39   : > { %1717 = vmatprep.subr.mxu0 %v2023_v37 }
  0x3b   : > { %1793 = vmatpush3.bf16.msra.mxu1 %v2273_v27 }
  0x3c   : > { %1794 = vmatprep.subr.bf16.mxu1 %v2021_v1 }
  0x3f   : > { %1796 = vmatpush3.bf16.msra.mxu1 %v1795_v30 }
  0x40   : > { %1797 = vmatprep.subr.bf16.mxu1 %v2021_v1 }
  0x43   : > { %1799 = vmatpush3.bf16.msra.mxu1 %v1798_v33 }
  0x44   : > { %1800 = vmatprep.subr.bf16.mxu1 %v2021_v1 }
  0x47   : > { %1802 = vmatpush3.bf16.msra.mxu1 %v1801_v36 }
  0x48   : > { %1803 = vmatprep.subr.bf16.mxu1 %v2021_v1 }
  0xfd   : > { %v1612_v39 = vpop.f32.mrb[0].mxu1 }
  0xfe   : > { %v438_v40 = vpop.f32.mrb[1].mxu1 }
  0xff   : > { %v1613_v41 = vpop.f32.mrb[2].mxu1 }
 0x100   : > { %v441_v42 = vpop.f32.mrb[3].mxu1 }
 0x109   : > { %v1640_v43 = vpop.f32.mrb[0].mxu0 }
 0x10a   : > { %v2303_v44 = vadd.f32 %v1640_v43, %v1612_v39  ;;  %v653_v45 = vpop.f32.mrb[1].mxu0 }
 0x10b   : > { %v1876_v46 = vadd.f32 %v653_v45, %v438_v40  ;;  %v1641_v47 = vpop.f32.mrb[2].mxu0 }
 0x10c   : > { %v1877_v48 = vadd.f32 %v1641_v47, %v1613_v41  ;;  %v656_v49 = vpop.f32.mrb[3].mxu0 }
 0x10d   : > { %v1878_v50 = vadd.f32 %v656_v49, %v441_v42  ;;  %v1184_v49 = vld [vmem:[%s2444_s5] sm:$0xff] }
 0x10e   : > { %v679_v51 = vadd.f32 %v1877_v48, %v2303_v44 }
 0x10f   : > { %v672_v52 = vadd.f32 %v1878_v50, %v1876_v46 }
 0x110   : > { %v680_v53 = vrot.slane %v679_v51, 4 }
 0x111   : > { %v673_v54 = vrot.slane %v672_v52, 4 }
 0x112   : > { %v681_v55 = vadd.f32 %v680_v53, %v679_v51 }
 0x113   : > { %v674_v56 = vadd.f32 %v673_v54, %v672_v52 }
 0x114   : > { %v682_v57 = vrot.slane %v681_v55, 2 }
 0x115   : > { %v675_v58 = vrot.slane %v674_v56, 2 }
 0x116   : > { %v683_v59 = vadd.f32 %v682_v57, %v681_v55 }
 0x117   : > { %v676_v60 = vadd.f32 %v675_v58, %v674_v56 }
 0x118   : > { %v684_v61 = vrot.slane %v683_v59, 1 }
 0x119   : > { %v677_v62 = vrot.slane %v676_v60, 1 }
 0x11a   : > { %v685_v63 = vadd.f32 %v684_v61, %v683_v59 }
 0x11b   : > { %v678_v0 = vadd.f32 %v677_v62, %v676_v60 }
 0x11d   : > { %v705_v2 = vsel %vm704_vm9, %v685_v63, %v678_v0 }
 0x11e   : > { %1675 = vmatmul.mubr.f32.vlgmr.msra.gmra.mrb[4].mxu1 %v705_v2 }
 0x11f   : > { %1805 = vmatpush3.bf16.msra.mxu1 %v2217_v5  ;;  %1714 = vmatprep.mubr.msk.f32.mxu1 %vm2022_vm8, %v2023_v37 }
 0x120   : > { %1806 = vmatprep.subr.bf16.mxu1 %v2021_v1 }
 0x123   : > { %1808 = vmatpush3.bf16.msra.mxu1 %v2232_v13 }
 0x124   : > { %1809 = vmatprep.subr.bf16.mxu1 %v2021_v1 }
 0x127   : > { %1811 = vmatpush3.bf16.msra.mxu1 %v2253_v21 }
 0x128   : > { %1812 = vmatprep.subr.bf16.mxu1 %v2021_v1 }
 0x12b   : > { %1814 = vmatpush3.bf16.msra.mxu1 %v2263_v24 }
 0x12c   : > { %1815 = vmatprep.subr.bf16.mxu1 %v2021_v1 }
 0x12f   : > { %1817 = vmatpush3.bf16.msra.mxu1 %v2273_v27 }
 0x130   : > { %1818 = vmatprep.subr.bf16.mxu1 %v2021_v1 }
 0x133   : > { %1820 = vmatpush3.bf16.msra.mxu1 %v1795_v30 }
 0x134   : > { %1821 = vmatprep.subr.bf16.mxu1 %v2021_v1 }
 0x137   : > { %1823 = vmatpush3.bf16.msra.mxu1 %v1798_v33 }
 0x138   : > { %1824 = vmatprep.subr.bf16.mxu1 %v2021_v1 }
 0x13b   : > { %1826 = vmatpush3.bf16.msra.mxu1 %v1801_v36 }
 0x1f1   : > { %v773_v3 = vpop.f32.mrb[4].mxu1 }
 0x1f2   : > { %v778_v4 = vmul.f32 0.00390625, %v773_v3  ;;  %v1676_v5 = vpop.f32.mrb[5].mxu1 }
 0x1f3   : > { %v1101_v5 = vld [vmem:[%s2443_s4 + $0x8] sm:$0xff] }
 0x1f4   : > { %1680 = vmatmul.mubr.msk.f32.vlgmr.msra.gmra.mrb[4].mxu0 %vm780_vm10, %v778_v4 }
 0x1f5   : > { %1718 = vmatpush3.msra.mxu0 %v779_v38  ;;  %1719 = vmatprep.mubr.msk.f32.mxu0 %vm2022_vm8, %v2023_v37 }
 0x2c7   : > { %v850_v12 = vpop.f32.mrb[4].mxu0 }
 0x2c8   : > { %v861_v13 = vrot.slane %v850_v12, %v860_v11  ;;  %v1681_v1 = vpop.f32.mrb[5].mxu0 }
 0x2ca   : > { %v862_v16 = vcombine.high %v861_v13, %v861_v13  ;;  %v869_v14 = vrot.slane %v861_v13, %v860_v11  ;;  %v1279_v13 = vld [vmem:[%s2445_s6 + $0x20] sm:$0xff] }
 0x2cc   : > { %v876_v17 = vrot.slane %v862_v16, %v860_v11  ;;  %v880_v18 = vrot.slane %v869_v14, %v879_v15  ;;  %v1281_v16 = vld [vmem:[%s2445_s6 + $0x30] sm:$0xff]  ;;  %v1282_v14 = vld [vmem:[%s2445_s6 + $0x38] sm:$0xff] }
 0x2ce   : > { %v884_v19 = vrot.slane %v876_v17, %v879_v15  ;;  %v887_v20 = vsub.f32 %v1876_v46, %v880_v18  ;;  %v888_v21 = vsub.f32 %v1878_v50, %v880_v18  ;;  %v1855_v17 = vpack.c.bf16 %v1282_v14, %v1281_v16  ;;  %v1283_v18 = vld [vmem:[%s2445_s6 + $0x40] sm:$0xff] }
 0x2d0   : > { %v889_v22 = vsub.f32 %v2303_v44, %v884_v19  ;;  %v890_v23 = vsub.f32 %v1877_v48, %v884_v19  ;;  %v891_v24 = vmul.f32 %v887_v20, %v887_v20  ;;  %v892_v25 = vmul.f32 %v888_v21, %v888_v21  ;;  %v1100_v48 = vld [vmem:[%s2443_s4] sm:$0xff]  ;;  %v1284_v19 = vld [vmem:[%s2445_s6 + $0x48] sm:$0xff] }
 0x2d2   : > { %v893_v26 = vmul.f32 %v889_v22, %v889_v22  ;;  %v894_v27 = vmul.f32 %v890_v23, %v890_v23  ;;  %v895_v28 = vadd.f32 %v892_v25, %v891_v24  ;;  %v1287_v24 = vld [vmem:[%s2445_s6 + $0x60] sm:$0xff]  ;;  %v1288_v25 = vld [vmem:[%s2445_s6 + $0x68] sm:$0xff] }
 0x2d4   : > { %v896_v29 = vrot.slane %v895_v28, 4  ;;  %v902_v30 = vadd.f32 %v894_v27, %v893_v26  ;;  %v1867_v26 = vpack.c.bf16 %v1288_v25, %v1287_v24  ;;  %v1289_v27 = vld [vmem:[%s2445_s6 + $0x70] sm:$0xff] }
 0x2d6   : > { %v897_v31 = vadd.f32 %v896_v29, %v895_v28  ;;  %v903_v32 = vrot.slane %v902_v30, 4  ;;  %v1290_v28 = vld [vmem:[%s2445_s6 + $0x78] sm:$0xff] }
 0x2d7   : > { %v1871_v29 = vpack.c.bf16 %v1290_v28, %v1289_v27 }
 0x2d8   : > { %v898_v33 = vrot.slane %v897_v31, 2  ;;  %v904_v34 = vadd.f32 %v903_v32, %v902_v30 }
 0x2da   : > { %v899_v35 = vadd.f32 %v898_v33, %v897_v31  ;;  %v905_v36 = vrot.slane %v904_v34, 2 }
 0x2dc   : > { %v900_v37 = vrot.slane %v899_v35, 1  ;;  %v906_v38 = vadd.f32 %v905_v36, %v904_v34 }
 0x2de   : > { %v907_v39 = vrot.slane %v906_v38, 1  ;;  %v901_v40 = vadd.f32 %v900_v37, %v899_v35 }
 0x2e0   : > { %v908_v41 = vadd.f32 %v907_v39, %v906_v38 }
 0x2e2   : > { %v911_v42 = vsel %vm704_vm9, %v908_v41, %v901_v40 }
 0x2e3   : > { %1715 = vmatmul.mubr.f32.vlgmr.msra.gmra.mrb[6].mxu1 %v911_v42 }
 0x2e4   : > { %1741 = vmatprep.mubr.msk.f32.mxu1 %vm1102_vm11, %v1184_v49 }
 0x3b6   : > { %v979_v43 = vpop.f32.mrb[6].mxu1 }
 0x3b7   : > { %v983_v44 = vmul.f32 0.00390625, %v979_v43  ;;  %v1716_v45 = vpop.f32.mrb[7].mxu1 }
 0x3b9   : > { %v984_v46 = vadd.f32 1e-05, %v983_v44 }
 0x3bb   : > { %1955 = vrsqrt.f32 %v984_v46 }
 0x3c5   : > { %v1956_v47 = vpop.eup %1955 }
 0x3c6   : > { %1720 = vmatmul.mubr.msk.f32.vlgmr.msra.gmra.mrb[6].mxu0 %vm780_vm10, %v1956_v47 }
 0x3c7   : > { %1730 = vmatprep.mubr.msk.f32.mxu0 %vm1102_vm11, %v1100_v48 }
 0x499   : > { %v1055_v50 = vpop.f32.mrb[6].mxu0 }
 0x49a   : > { %v1066_v51 = vrot.slane %v1055_v50, %v860_v11  ;;  %v1721_v52 = vpop.f32.mrb[7].mxu0 }
 0x49c   : > { %v1067_v53 = vcombine.high %v1066_v51, %v1066_v51  ;;  %v1074_v54 = vrot.slane %v1066_v51, %v860_v11 }
 0x49e   : > { %v1081_v55 = vrot.slane %v1067_v53, %v860_v11  ;;  %v1085_v56 = vrot.slane %v1074_v54, %v879_v15  ;;  %v1278_v11 = vld [vmem:[%s2445_s6 + $0x18] sm:$0xff] }
 0x49f   : > { %v1847_v12 = vpack.c.bf16 %v1278_v11, %v1277_v9 }
 0x4a0   : > { %v1089_v57 = vrot.slane %v1081_v55, %v879_v15  ;;  %v1092_v58 = vmul.f32 %v1085_v56, %v887_v20  ;;  %v1093_v59 = vmul.f32 %v1085_v56, %v888_v21  ;;  %v1280_v15 = vld [vmem:[%s2445_s6 + $0x28] sm:$0xff]  ;;  %v1859_v20 = vpack.c.bf16 %v1284_v19, %v1283_v18  ;;  %v1285_v21 = vld [vmem:[%s2445_s6 + $0x50] sm:$0xff] }
 0x4a1   : > { %v1851_v1 = vpack.c.bf16 %v1280_v15, %v1279_v13 }
 0x4a2   : > { %v1094_v60 = vmul.f32 %v1089_v57, %v889_v22  ;;  %v1095_v61 = vmul.f32 %v1089_v57, %v890_v23  ;;  %v1096_v62 = vmax.f32 %v1092_v58, 0.0  ;;  %v1097_v63 = vmax.f32 %v1093_v59, 0.0  ;;  %v1286_v22 = vld [vmem:[%s2445_s6 + $0x58] sm:$0xff] }
 0x4a3   : > { %v1863_v23 = vpack.c.bf16 %v1286_v22, %v1285_v21 }
 0x4a4   : > { %v1098_v0 = vmax.f32 %v1094_v60, 0.0  ;;  %v1099_v2 = vmax.f32 %v1095_v61, 0.0  ;;  %v1827_v3 = vpack.c.bf16 %v1097_v63, %v1096_v62 }
 0x4a6   : > { %1828 = vmatprep.subr.bf16.mxu0 %v1827_v3  ;;  %1836 = vmatprep.subr.bf16.mxu1 %v1827_v3  ;;  %v1831_v4 = vpack.c.bf16 %v1099_v2, %v1098_v0 }
 0x4a7   : > { %1830 = vmatpush3.bf16.msra.mxu0 %v1827_v3  ;;  %1838 = vmatpush3.bf16.msra.mxu1 %v1827_v3 }
 0x4a8   : > { %1832 = vmatprep.subr.bf16.mxu0 %v1831_v4  ;;  %1840 = vmatprep.subr.bf16.mxu1 %v1831_v4 }
 0x4ab   : > { %1834 = vmatpush3.bf16.msra.mxu0 %v1831_v4  ;;  %1842 = vmatpush3.bf16.msra.mxu1 %v1831_v4 }
 0x4ac   : > { %1844 = vmatprep.subr.bf16.mxu0 %v1843_v10 }
 0x4ae   : > { %1731 = vmatmul.mubr.msk.f32.vlgmr.msra.gmra.mrb[8].mxu0 %vm1102_vm11, %v1101_v5  ;;  %1742 = vmatmul.mubr.msk.f32.vlgmr.msra.gmra.mrb[8].mxu1 %vm1102_vm11, %v1185_v6 }
 0x4af   : > { %1846 = vmatpush3.bf16.msra.mxu0 %v1843_v10 }
 0x4b0   : > { %1848 = vmatprep.subr.bf16.mxu0 %v1847_v12 }
 0x4b3   : > { %1850 = vmatpush3.bf16.msra.mxu0 %v1847_v12 }
 0x4b4   : > { %1852 = vmatprep.subr.bf16.mxu0 %v1851_v1 }
 0x4b7   : > { %1854 = vmatpush3.bf16.msra.mxu0 %v1851_v1 }
 0x4b8   : > { %1856 = vmatprep.subr.bf16.mxu0 %v1855_v17 }
 0x4bb   : > { %1858 = vmatpush3.bf16.msra.mxu0 %v1855_v17 }
 0x4bc   : > { %1860 = vmatprep.subr.bf16.mxu0 %v1859_v20 }
 0x4bf   : > { %1862 = vmatpush3.bf16.msra.mxu0 %v1859_v20 }
 0x4c0   : > { %1864 = vmatprep.subr.bf16.mxu0 %v1863_v23 }
 0x4c3   : > { %1866 = vmatpush3.bf16.msra.mxu0 %v1863_v23 }
 0x4c4   : > { %1868 = vmatprep.subr.bf16.mxu0 %v1867_v26 }
 0x4c7   : > { %1870 = vmatpush3.bf16.msra.mxu0 %v1867_v26 }
 0x4c8   : > { %1872 = vmatprep.subr.bf16.mxu0 %v1871_v29 }
 0x4cb   : > { %1874 = vmatpush3.bf16.msra.mxu0 %v1871_v29 }
 0x581   : > { %v1732_v30 = vpop.f32.mrb[8].mxu0  ;;  %v1743_v31 = vpop.f32.mrb[8].mxu1 }
 0x582   : > { %v1268_v32 = vmax.f32 %v1732_v30, %v1743_v31  ;;  %v1175_v33 = vpop.f32.mrb[9].mxu0  ;;  %v1258_v34 = vpop.f32.mrb[9].mxu1 }
 0x583   : > { %v1267_v35 = vmax.f32 %v1175_v33, %v1258_v34 }
 0x585   : > { %v1933_v36 = vpack.i.bf16 %v1268_v32, %v1267_v35 }
 0x587   : > { %1934 = vrot.lane.b32.xlu0 %v1933_v36, %s2025_s29 }
 0x5f9   : > { %v1935_v37 = vpop.permute.xlu0 %1934 }
 0x5fa   : > { %v1937_v38 = vunpack.i.h.bf16 %v1935_v37  ;;  %v1936_v39 = vunpack.i.l.bf16 %v1935_v37 }
 0x5fc   : > { %v1274_v40 = vmax.f32 %v1268_v32, %v1937_v38  ;;  %v1273_v41 = vmax.f32 %v1267_v35, %v1936_v39 }
 0x5fe   : > { %1776 = vmatprep.mubr.f32.mxu0 %v1273_v41 }
 0x5ff   : > { %1777 = vmatmul.mubr.f32.vlgmr.msra.gmra.mrb[10].mxu0 %v1274_v40 }
 0x6d2   : > { %v1778_v42 = vpop.f32.mrb[10].mxu0 }
 0x6d3   : > { %1368 = vst.msk [vmem:[%s274_s13 + $0x8] sm:$0xff] %vm1366_vm12, %v1778_v42  ;;  %v1357_v43 = vpop.f32.mrb[11].mxu0 }
 0x6d4   : > { %1367 = vst.msk [vmem:[%s274_s13] sm:$0xff] %vm1366_vm12, %v1357_v43 }
 0x6d5   : > { %1970 = shalt.err (!%p1967_p3)
}
 0x6d6   : > { %s1971_s23 = scalar_lea.hbm %s2396_s17, 256  ;;  %s1975_s9 = scalar_lea.hbm %s2446_s7, 512 }
 0x6d7   : > { %p1972_p4 = scmp.ne.s32.totalorder %s2396_s17, %s1971_s23  ;;  %p1976_p9 = scmp.lt.u32.totalorder %s2396_s17, %s2446_s7 }
 0x6d8   : > { %p1977_p10 = scmp.lt.u32.totalorder %s1975_s9, %s1971_s23  ;;  %p1979_p12 = scmp.lt.u32.totalorder %s1971_s23, %s2396_s17 }
 0x6d9   : > { %p1973_p7 = pnand %p1972_p4, %p2107_p5 }
 0x6da   : > { %p1978_p11 = por %p1977_p10, %p1976_p9 }
 0x6db   : > { %p1974_p8 = pneg %p1973_p7 }
 0x6dc   : > { %p1980_p13 = por %p1979_p12, %p1978_p11 }
 0x6de   : > { %p1981_p0 = pnand %p1980_p13, %p1974_p8 }
 0x6e0   : > { %1984 = shalt.err (!%p1981_p0)
}
 0x6e1   : > { %s2027_s16 = smov 128   ;;  %s2028_s18 = smov 8  }
 0x6e2   : > { %1887 = dma.vmem_to_hbm [thread:$0]  (%p2107_p5), %s2391_s14, 256, %s2396_s17, %s2398_s19, %s2027_s16, %s2027_s16, %s2028_s18  }
 0x6e3 PF: > { %p1893_p1 = scmp.ge.s32.totalorder %s2019_s27, 2  ;;  %s1398_s20 = sand.u32 1, %s2007_s24  }
 0x6e4   : > { %s1399_s28 = scalar_lea.sflag [#allocation3], %s1398_s20 }
 0x6e5   : > { %p1890_p2 = pnand %p1893_p1, %p2111_p6 }
 0x6e7   : > { %2002 = dma.done.wait (!%p1890_p2), %s1399_s28, 256  }
 0x6e8   : > { %2004 = vsyncadd (!%p1890_p2), %s1399_s28, 4294967040  ;;  %p17_p3 = scmp.ge.s32.totalorder %s2094_s30, 4   ;;  %s2453_s24 = smov %s2011_s25 }
 0x6e9   : > { %s2454_s25 = smov %s2015_s26  ;;  %s2455_s26 = smov %s2105_s10 }
 0x6ea   : > { %s2456_s27 = smov %s2094_s30  ;;  %19 = sbr.rel (!%p17_p3) target bundleno = 3 (0x3), region = 85 }
 0x6f1   :  { %1404 = vsyncpa [#allocation3], 1 }
 0x6f2   :  { %1406 = vsyncpa [#allocation3 + $0x1], 1 }

// kernel: tpu_custom_call.1
= control target key start
LH: loop header
LB: loop body
LE: loop exit
PB: predicated region body
PF: predicated region fallthrough
CT: control target
= control target key end

     0   :  { %12 = vsyncpa [#allocation3], 0  ;;  %s2439_s0 = inlined_call_operand.vmem [shape: bf16[4,18,72], index: 0, kind: input, shape index: {}]   ;;  %s2440_s1 = inlined_call_operand.vmem [shape: bf16[3,72,128], index: 1, kind: input, shape index: {}]   ;;  %s2441_s2 = inlined_call_operand.vmem [shape: f32[128,8], index: 2, kind: input, shape index: {}]   ;;  %s2442_s3 = inlined_call_operand.vmem [shape: f32[8,128], index: 3, kind: input, shape index: {}]   ;;  %s2443_s4 = inlined_call_operand.vmem [shape: f32[16,32], index: 4, kind: input, shape index: {}]   ;;  %s2444_s5 = inlined_call_operand.vmem [shape: f32[16,32], index: 5, kind: input, shape index: {}]   ;;  %s2445_s6 = inlined_call_operand.vmem [shape: f32[128,64], index: 6, kind: input, shape index: {}]   ;;  %s2446_s7 = inlined_call_operand.hbm [shape: f32[4,8,64], index: 7, kind: output, shape index: {}]  }
   0x1   :  { %14 = vsyncpa [#allocation3 + $0x1], 0  ;;  %s2069_s24 = smov 0   ;;  %s2071_s25 = smov 0  }
   0x2   :  { %s2073_s26 = smov 0   ;;  %s2075_s27 = smov 0  }
   0x3 LB: > { %s2090_s28 = sadd.s32 4294967295, %s2019_s27   ;;  %s1445_s29 = sadd.s32 4294967294, %s2019_s27   ;;  %s2019_s27 = sphi %s2075_s27, %s2456_s27   ;;  %s2015_s26 = sphi %s2073_s26, %s2455_s26   ;;  %s2011_s25 = sphi %s2071_s25, %s2454_s25   ;;  %s2007_s24 = sphi %s2069_s24, %s2453_s24  }
   0x4   : > { %s2094_s30 = sadd.s32 1, %s2019_s27   ;;  %s179_s8 = sadd.s32 1, %s2015_s26 }
   0x5   : > { %s176_s9 = ssub.s32 %s2019_s27, %s2094_s30  ;;  %p189_p0 = scmp.ne.s32.totalorder %s2015_s26, %s2011_s25 }
   0x6   : > { %p177_p1 = scmp.eq.s32.totalorder %s176_s9, 0  ;;  %p190_p2 = scmp.eq.s32.totalorder %s2090_s28, 1 }
   0x7   : > { %p195_p3 = scmp.ne.s32.totalorder %s2011_s25, %s2007_s24  ;;  %p196_p4 = scmp.eq.s32.totalorder %s1445_s29, 1 }
   0x8   : > { %s2105_s10 = scalar_select %p177_p1, %s2015_s26, %s179_s8  }
   0x9   : > { %p2107_p5 = por %p190_p2, %p189_p0  ;;  %p2111_p6 = por %p196_p4, %p195_p3 }
   0xa   : > { %p1448_p7 = scmp.ge.s32.totalorder %s2019_s27, 1  ;;  %p242_p8 = scmp.lt.s32.totalorder %s2019_s27, 3 }
   0xc   : > { %p243_p9 = pnand %p1448_p7, %p242_p8 }
   0xd   : > { %v1938_v0 = vld [vmem:[%s2440_s1] sm:$0xff] (!%p243_p9)   ;;  %v1939_v1 = vld [vmem:[%s2440_s1 + $0x8] sm:$0xff] (!%p243_p9)   ;;  %s1450_s17 = sshll.u32 (!%p243_p9), %s2090_s28, 1  ;;  %v1940_v2 = vld [vmem:[%s2440_s1 + $0x10] sm:$0xff] (!%p243_p9)   ;;  %vm400_vm0 = vcmask (!%p243_p9), 1043456   ;;  %vm393_vm1 = vcmask (!%p243_p9), 588800  }
   0xe   : > { %246 = sbr.rel (%p243_p9) target bundleno = 1763 (0x6e3), region = 48  ;;  %1614 = vmatprep.subr.bf16.mxu0 (!%p243_p9), %v1938_v0  ;;  %p276_p10 = scmp.lt.s32.totalorder (!%p243_p9), %s1450_s17, 3  ;;  %v1943_v3 = vld [vmem:[%s2440_s1 + $0x24] sm:$0xff] (!%p243_p9)   ;;  %v1942_v4 = vld [vmem:[%s2440_s1 + $0x20] ss:$0 sps:$4 sm:$0xff] (!%p243_p9)   ;;  %v1946_v5 = vld [vmem:[%s2440_s1 + $0x2c] sm:$0xff] (!%p243_p9)  }
   0xf   : > { %1615 = vmatpush3.bf16.msra.mxu0 (!%p243_p9), %v1938_v0  ;;  %1600 = vmatprep.subr.bf16.mxu1 (!%p243_p9), %v1943_v3  ;;  %v1941_v6 = vld [vmem:[%s2440_s1 + $0x18] sm:$0xff] (!%p243_p9)   ;;  %v497_v8 = vsel (!%p243_p9), %vm400_vm0, %v1942_v4, 0  ;;  %vm550_vm2 = vcmask (!%p243_p9), 1042432   ;;  %vm551_vm3 = vcmask (!%p243_p9), 1046532   ;;  %v1945_v23 = vld [vmem:[%s2440_s1 + $0x48] sm:$0xff] (!%p243_p9)   ;;  %v1948_v42 = vld [vmem:[%s2440_s1 + $0x50] sm:$0xff] (!%p243_p9)  }
  0x10   : > { %1616 = vmatprep.subr.bf16.mxu0 (!%p243_p9), %v1939_v1  ;;  %1601 = vmatpush3.bf16.msra.mxu1 (!%p243_p9), %v1943_v3  ;;  %v1949_v7 = vld [vmem:[%s2440_s1 + $0x34] sm:$0xff] (!%p243_p9)   ;;  %v1951_v21 = vld [vmem:[%s2440_s1 + $0x3c] sm:$0xff] (!%p243_p9)   ;;  %vm2168_vm4 = vmor (!%p243_p9), %vm550_vm2, %vm551_vm3  ;;  %vm299_vm5 = vsmask.f32 (!%p243_p9), 3328  ;;  %vm300_vm6 = vsmask.f32 (!%p243_p9), 7440 }
  0x11   : > { %1602 = vmatprep.subr.bf16.mxu1 (!%p243_p9), %v1946_v5  ;;  %v1953_v26 = vld [vmem:[%s2440_s1 + $0x44] ss:$0 sps:$4 sm:$0xff] (!%p243_p9)   ;;  %vm2189_vm7 = vmor (!%p243_p9), %vm299_vm5, %vm300_vm6  ;;  %v1950_v58 = vld [vmem:[%s2440_s1 + $0x58] sm:$0xff] (!%p243_p9)   ;;  %vm2022_vm8 = vmmov (!%p243_p9), 0   ;;  %vm704_vm9 = vcmask (!%p243_p9), 1041409   ;;  %vm780_vm10 = vcmask (!%p243_p9), 64512  }
  0x12   : > { %v402_v43 = vsel (!%p243_p9), %vm400_vm0, %v1953_v26, 0  ;;  %v686_v60 = vld [vmem:[%s2441_s2] sm:$0xff] (!%p243_p9)  ;;  %v687_v61 = vld [vmem:[%s2441_s2 + $0x8] sm:$0xff] (!%p243_p9)  ;;  %vm1102_vm11 = vcmask (!%p243_p9), 261120   ;;  %s272_s8 = sand.u32 (!%p243_p9), 1, %s2011_s25   ;;  %s1510_s15 = sshll.u32 (!%p243_p9), %s2090_s28, 8 }
  0x13   : > { %1617 = vmatpush3.bf16.msra.mxu0 (!%p243_p9), %v1939_v1  ;;  %v2021_v1 = vmov (!%p243_p9), 0.0|0.0   ;;  %v694_v25 = vld [vmem:[%s2441_s2 + $0x40] sm:$0xff] (!%p243_p9)  ;;  %s1449_s9 = sshll.u32 (!%p243_p9), %s272_s8, 4  ;;  %vm1366_vm12 = vcmask (!%p243_p9), 523264   ;;  %s2398_s19 = scalar_lea.sflag (!%p243_p9), [#allocation3], %s272_s8 }
  0x14   : > { %1618 = vmatprep.subr.bf16.mxu0 (!%p243_p9), %v1940_v2  ;;  %1603 = vmatpush3.bf16.msra.mxu1 (!%p243_p9), %v1946_v5  ;;  %v2217_v5 = vpack.c.bf16 (!%p243_p9), %v687_v61, %v686_v60  ;;  %s274_s13 = scalar_lea.vmem (!%p243_p9), [#allocation2], %s1449_s9  ;;  %s2026_s28 = smov (!%p243_p9), [#allocation2]  }
  0x15   : > { %s2458_s17 = smov (!%p276_p10, %s1450_s17), 3  ;;  %1604 = vmatprep.subr.bf16.mxu1 %v1949_v7  ;;  %s1383_s14 = sshll.u32 %s274_s13, 4  ;;  %s2391_s14 = int_to_ptr.vmem [resolvable:$true] %s1383_s14 }
  0x16   : > { %s1886_s29 = smul.u32 12, %s2458_s17  ;;  %s2396_s17 = scalar_lea.hbm %s2446_s7, %s1510_s15 }
  0x17   : > { %1619 = vmatpush3.bf16.msra.mxu0 %v1940_v2  ;;  %s1957_s20 = scalar_lea.vmem %s2391_s14, 256  ;;  %s1961_s21 = sshll.u32 %s2026_s28, 4  ;;  %s1962_s21 = int_to_ptr.vmem [resolvable:$false] %s1961_s21 }
  0x18   : > { %s2142_s18 = scalar_lea.vmem %s2439_s0, %s1886_s29  ;;  %1620 = vmatprep.subr.bf16.mxu0 %v1941_v6  ;;  %1605 = vmatpush3.bf16.msra.mxu1 %v1949_v7  ;;  %s2025_s29 = smov 120  }
  0x19   : > { %v284_v9 = vld [vmem:[%s2142_s18] sm:$0xf]  ;;  %v285_v10 = vld [vmem:[%s2142_s18 + $0x4] sm:$0xf]  ;;  %v2151_v14 = vld [vmem:[%s2142_s18 + $0xc] sm:$0xf]  ;;  %1606 = vmatprep.subr.bf16.mxu1 %v1951_v21  ;;  %p1958_p11 = scmp.ne.s32.totalorder %s2391_s14, %s1957_s20  ;;  %p1964_p0 = scmp.lt.s32.totalorder %s2391_s14, %s1962_s21 }
  0x1a   : > { %v303_v11 = vshrl.u32 %v284_v9, 16  ;;  %v306_v12 = vshll.u32 %v284_v9, 16  ;;  %v1470_v13 = vcombine.low %v284_v9, %v285_v10  ;;  %v316_v15 = vshrl.u32 %v285_v10, 16  ;;  %v2154_v17 = vld [vmem:[%s2142_s18 + $0x10] sm:$0xf]  ;;  %s1963_s22 = scalar_lea.vmem %s1962_s21, 512 }
  0x1b   : > { %v555_v16 = vrot.slane %v285_v10, 5  ;;  %v1479_v18 = vrot.slane %v284_v9, 9  ;;  %v327_v19 = vshrl.u32 %v2151_v14, 16  ;;  %v330_v20 = vshll.u32 %v2151_v14, 16  ;;  %1621 = vmatpush3.bf16.msra.mxu0 %v1941_v6  ;;  %v286_v28 = vld [vmem:[%s2142_s18 + $0x8] sm:$0x1]  ;;  %p1959_p12 = pnand %p1958_p11, %p2107_p5  ;;  %p1965_p1 = scmp.lt.s32.totalorder %s1963_s22, %s1957_s20 }
  0x1c   : > { %1624 = vmatprep.mubr.msk.bf16.mxu0 %vm393_vm1, %v1470_v13  ;;  %v340_v24 = vshrl.u32 %v2154_v17, 16  ;;  %1884 = vmatprep.subr.msk.bf16.mxu0 %vm400_vm0, %v1942_v4  ;;  %v1471_v27 = vcombine.low %v2151_v14, %v2154_v17  ;;  %v305_v29 = vrot.slane %v303_v11, 4  ;;  %v308_v30 = vrot.slane %v306_v12, 5  ;;  %v289_v39 = vld [vmem:[%s2142_s18 + $0x14] sm:$0x1]  ;;  %v1952_v6 = vld [vmem:[%s2440_s1 + $0x60] sm:$0xff]  }
  0x1d   : > { %v557_v22 = vrot.slane %v555_v16, 4  ;;  %v312_v31 = vshll.u32 %v285_v10, 16  ;;  %v556_v32 = vsel %vm2168_vm4, %v1479_v18, %v555_v16  ;;  %v318_v33 = vrot.slane %v316_v15, 4  ;;  %1607 = vmatpush3.bf16.msra.mxu1 %v1951_v21  ;;  %v689_v9 = vld [vmem:[%s2441_s2 + $0x18] sm:$0xff]  ;;  %v1954_v15 = vld [vmem:[%s2440_s1 + $0x68] ss:$0 sps:$4 sm:$0xff]   ;;  %p1960_p13 = pneg %p1959_p12  ;;  %p1966_p2 = por %p1965_p1, %p1964_p0 }
  0x1e   : > { %v322_v34 = vshll.u32 %v286_v28, 16  ;;  %v558_v35 = vrot.slane %v286_v28, 5  ;;  %v329_v36 = vrot.slane %v327_v19, 4  ;;  %v309_v37 = vor.u32 %v308_v30, %v305_v29  ;;  %1883 = vmatprep.subr.msk.bf16.mxu1 %vm400_vm0, %v1953_v26  ;;  %v690_v19 = vld [vmem:[%s2441_s2 + $0x20] sm:$0xff]  ;;  %v695_v26 = vld [vmem:[%s2441_s2 + $0x48] sm:$0xff]  ;;  %v696_v28 = vld [vmem:[%s2441_s2 + $0x50] sm:$0xff] }
  0x1f   : > { %1623 = vmatpush3.bf16.msra.mxu0 %v497_v8  ;;  %v314_v38 = vrot.slane %v312_v31, 5  ;;  %v332_v40 = vrot.slane %v330_v20, 5  ;;  %v336_v41 = vshll.u32 %v2154_v17, 16  ;;  %v342_v46 = vrot.slane %v340_v24, 4  ;;  %v688_v8 = vld [vmem:[%s2441_s2 + $0x10] sm:$0xff]  ;;  %v691_v20 = vld [vmem:[%s2441_s2 + $0x28] sm:$0xff]  ;;  %p1967_p3 = pnand %p1966_p2, %p1960_p13 }
  0x20   : > { %1628 = vmatprep.subr.bf16.mxu0 %v1945_v23  ;;  %v324_v45 = vrot.slane %v322_v34, 5  ;;  %v346_v47 = vshll.u32 %v289_v39, 16  ;;  %v310_v48 = vrot.slane %v309_v37, 4  ;;  %v559_v53 = vsel %vm2168_vm4, %v557_v22, %v558_v35  ;;  %v692_v22 = vld [vmem:[%s2441_s2 + $0x30] sm:$0xff]  ;;  %v697_v29 = vld [vmem:[%s2441_s2 + $0x58] sm:$0xff]  ;;  %v698_v31 = vld [vmem:[%s2441_s2 + $0x60] sm:$0xff] }
  0x21   : > { %v319_v49 = vor.u32 %v318_v33, %v314_v38  ;;  %v333_v50 = vor.u32 %v332_v40, %v329_v36  ;;  %v338_v51 = vrot.slane %v336_v41, 5  ;;  %1609 = vmatpush3.bf16.msra.mxu1 %v402_v43  ;;  %v1490_v59 = vcombine.low %v556_v32, %v559_v53  ;;  %v699_v32 = vld [vmem:[%s2441_s2 + $0x68] sm:$0xff]  ;;  %v700_v34 = vld [vmem:[%s2441_s2 + $0x70] sm:$0xff]  ;;  %v701_v35 = vld [vmem:[%s2441_s2 + $0x78] sm:$0xff] }
  0x22   : > { %1625 = vmatmul.mubr.msk.bf16.vlgmr.msra.gmra.mrb[0].mxu0 %vm393_vm1, %v1471_v27  ;;  %v348_v52 = vrot.slane %v346_v47, 5  ;;  %v315_v54 = vsel %vm2189_vm7, %v310_v48, %v314_v38  ;;  %1779 = vmatprep.subr.bf16.mxu1 %v2021_v1  ;;  %v562_v3 = vrot.slane %v2154_v17, 5  ;;  %v1480_v10 = vrot.slane %v2151_v14, 9  ;;  %v779_v38 = vld [vmem:[%s2442_s3] sm:$0xff] }
  0x23   : > { %1629 = vmatpush3.bf16.msra.mxu0 %v1945_v23  ;;  %v320_v55 = vrot.slane %v319_v49, 4  ;;  %v334_v56 = vrot.slane %v333_v50, 4  ;;  %v343_v57 = vor.u32 %v342_v46, %v338_v51  ;;  %1638 = vmatprep.mubr.msk.bf16.mxu0 %vm393_vm1, %v1490_v59  ;;  %v565_v11 = vrot.slane %v289_v39, 5  ;;  %v693_v23 = vld [vmem:[%s2441_s2 + $0x38] sm:$0xff] }
  0x24   : > { %1630 = vmatprep.subr.bf16.mxu0 %v1948_v42  ;;  %v564_v12 = vrot.slane %v562_v3, 4  ;;  %v2232_v13 = vpack.c.bf16 %v689_v9, %v688_v8  ;;  %v563_v16 = vsel %vm2168_vm4, %v1480_v10, %v562_v3  ;;  %v617_v17 = vsel %vm400_vm0, %v1954_v15, 0 }
  0x25   : > { %v325_v62 = vsel %vm2189_vm7, %v320_v55, %v324_v45  ;;  %v339_v63 = vsel %vm2189_vm7, %v334_v56, %v338_v51  ;;  %v344_v0 = vrot.slane %v343_v57, 4  ;;  %v2253_v21 = vpack.c.bf16 %v691_v20, %v690_v19 }
  0x26   : > { %v1461_v2 = vcombine.low %v315_v54, %v325_v62  ;;  %v566_v14 = vsel %vm2168_vm4, %v564_v12, %v565_v11  ;;  %v2263_v24 = vpack.c.bf16 %v693_v23, %v692_v22  ;;  %v2273_v27 = vpack.c.bf16 %v695_v26, %v694_v25 }
  0x27   : > { %1631 = vmatpush3.bf16.msra.mxu0 %v1948_v42  ;;  %v349_v4 = vsel %vm2189_vm7, %v344_v0, %v348_v52  ;;  %v1491_v18 = vcombine.low %v563_v16, %v566_v14  ;;  %v1795_v30 = vpack.c.bf16 %v697_v29, %v696_v28  ;;  %v1798_v33 = vpack.c.bf16 %v699_v32, %v698_v31 }
  0x28   : > { %1632 = vmatprep.subr.bf16.mxu0 %v1950_v58  ;;  %1610 = vmatprep.mubr.msk.bf16.mxu1 %vm393_vm1, %v1461_v2  ;;  %v1462_v7 = vcombine.low %v339_v63, %v349_v4  ;;  %v1801_v36 = vpack.c.bf16 %v701_v35, %v700_v34  ;;  %v2023_v37 = vmov 0.0   ;;  %v858_v8 = vlaneseq }
  0x2a   : > { %1611 = vmatmul.mubr.msk.bf16.vlgmr.msra.gmra.mrb[0].mxu1 %vm393_vm1, %v1462_v7  ;;  %v859_v10 = vshrl.u32 %v858_v8, 7  ;;  %v1276_v8 = vld [vmem:[%s2445_s6 + $0x8] sm:$0xff] }
  0x2b   : > { %1633 = vmatpush3.bf16.msra.mxu0 %v1950_v58  ;;  %1781 = vmatpush3.bf16.msra.mxu1 %v2217_v5 }
  0x2c   : > { %1634 = vmatprep.subr.bf16.mxu0 %v1952_v6  ;;  %1782 = vmatprep.subr.bf16.mxu1 %v2021_v1 }
  0x2d   : > { %1674 = vmatprep.mubr.msk.f32.mxu1 %vm2022_vm8, %v2023_v37 }
  0x2f   : > { %1635 = vmatpush3.bf16.msra.mxu0 %v1952_v6  ;;  %1784 = vmatpush3.bf16.msra.mxu1 %v2232_v13  ;;  %v2024_v6 = vmov 1966171168  }
  0x30   : > { %1885 = vmatprep.subr.msk.bf16.mxu0 %vm400_vm0, %v1954_v15  ;;  %1785 = vmatprep.subr.bf16.mxu1 %v2021_v1  ;;  %v856_v7 = vunpack.c.l.s4 %v2024_v6  ;;  %v879_v15 = vsub.s32 0, %v859_v10  ;;  %v1185_v6 = vld [vmem:[%s2444_s5 + $0x8] sm:$0xff] }
  0x32   : > { %v857_v9 = vunpack.c.0.s8 %v856_v7  ;;  %v1275_v7 = vld [vmem:[%s2445_s6] sm:$0xff] }
  0x33   : > { %1637 = vmatpush3.bf16.msra.mxu0 %v617_v17  ;;  %1787 = vmatpush3.bf16.msra.mxu1 %v2253_v21 }
  0x34   : > { %1788 = vmatprep.subr.bf16.mxu1 %v2021_v1  ;;  %1677 = vmatprep.subr.mxu0 %v2023_v37  ;;  %v860_v11 = vsub.s32 %v857_v9, %v859_v10  ;;  %v1277_v9 = vld [vmem:[%s2445_s6 + $0x10] sm:$0xff]  ;;  %v1843_v10 = vpack.c.bf16 %v1276_v8, %v1275_v7 }
  0x36   : > { %1639 = vmatmul.mubr.msk.bf16.vlgmr.msra.gmra.mrb[0].mxu0 %vm393_vm1, %v1491_v18 }
  0x37   : > { %1790 = vmatpush3.bf16.msra.mxu1 %v2263_v24  ;;  %1679 = vmatprep.mubr.msk.f32.mxu0 %vm2022_vm8, %v2023_v37 }
  0x38   : > { %1791 = vmatprep.subr.bf16.mxu1 %v2021_v1  ;;  %1678 = vmatpush3.msra.mxu0 %v779_v38 }
  0x39   : > { %1717 = vmatprep.subr.mxu0 %v2023_v37 }
  0x3b   : > { %1793 = vmatpush3.bf16.msra.mxu1 %v2273_v27 }
  0x3c   : > { %1794 = vmatprep.subr.bf16.mxu1 %v2021_v1 }
  0x3f   : > { %1796 = vmatpush3.bf16.msra.mxu1 %v1795_v30 }
  0x40   : > { %1797 = vmatprep.subr.bf16.mxu1 %v2021_v1 }
  0x43   : > { %1799 = vmatpush3.bf16.msra.mxu1 %v1798_v33 }
  0x44   : > { %1800 = vmatprep.subr.bf16.mxu1 %v2021_v1 }
  0x47   : > { %1802 = vmatpush3.bf16.msra.mxu1 %v1801_v36 }
  0x48   : > { %1803 = vmatprep.subr.bf16.mxu1 %v2021_v1 }
  0xfd   : > { %v1612_v39 = vpop.f32.mrb[0].mxu1 }
  0xfe   : > { %v438_v40 = vpop.f32.mrb[1].mxu1 }
  0xff   : > { %v1613_v41 = vpop.f32.mrb[2].mxu1 }
 0x100   : > { %v441_v42 = vpop.f32.mrb[3].mxu1 }
 0x109   : > { %v1640_v43 = vpop.f32.mrb[0].mxu0 }
 0x10a   : > { %v2303_v44 = vadd.f32 %v1640_v43, %v1612_v39  ;;  %v653_v45 = vpop.f32.mrb[1].mxu0 }
 0x10b   : > { %v1876_v46 = vadd.f32 %v653_v45, %v438_v40  ;;  %v1641_v47 = vpop.f32.mrb[2].mxu0 }
 0x10c   : > { %v1877_v48 = vadd.f32 %v1641_v47, %v1613_v41  ;;  %v656_v49 = vpop.f32.mrb[3].mxu0 }
 0x10d   : > { %v1878_v50 = vadd.f32 %v656_v49, %v441_v42  ;;  %v1184_v49 = vld [vmem:[%s2444_s5] sm:$0xff] }
 0x10e   : > { %v679_v51 = vadd.f32 %v1877_v48, %v2303_v44 }
 0x10f   : > { %v672_v52 = vadd.f32 %v1878_v50, %v1876_v46 }
 0x110   : > { %v680_v53 = vrot.slane %v679_v51, 4 }
 0x111   : > { %v673_v54 = vrot.slane %v672_v52, 4 }
 0x112   : > { %v681_v55 = vadd.f32 %v680_v53, %v679_v51 }
 0x113   : > { %v674_v56 = vadd.f32 %v673_v54, %v672_v52 }
 0x114   : > { %v682_v57 = vrot.slane %v681_v55, 2 }
 0x115   : > { %v675_v58 = vrot.slane %v674_v56, 2 }
 0x116   : > { %v683_v59 = vadd.f32 %v682_v57, %v681_v55 }
 0x117   : > { %v676_v60 = vadd.f32 %v675_v58, %v674_v56 }
 0x118   : > { %v684_v61 = vrot.slane %v683_v59, 1 }
 0x119   : > { %v677_v62 = vrot.slane %v676_v60, 1 }
 0x11a   : > { %v685_v63 = vadd.f32 %v684_v61, %v683_v59 }
 0x11b   : > { %v678_v0 = vadd.f32 %v677_v62, %v676_v60 }
 0x11d   : > { %v705_v2 = vsel %vm704_vm9, %v685_v63, %v678_v0 }
 0x11e   : > { %1675 = vmatmul.mubr.f32.vlgmr.msra.gmra.mrb[4].mxu1 %v705_v2 }
 0x11f   : > { %1805 = vmatpush3.bf16.msra.mxu1 %v2217_v5  ;;  %1714 = vmatprep.mubr.msk.f32.mxu1 %vm2022_vm8, %v2023_v37 }
 0x120   : > { %1806 = vmatprep.subr.bf16.mxu1 %v2021_v1 }
 0x123   : > { %1808 = vmatpush3.bf16.msra.mxu1 %v2232_v13 }
 0x124   : > { %1809 = vmatprep.subr.bf16.mxu1 %v2021_v1 }
 0x127   : > { %1811 = vmatpush3.bf16.msra.mxu1 %v2253_v21 }
 0x128   : > { %1812 = vmatprep.subr.bf16.mxu1 %v2021_v1 }
 0x12b   : > { %1814 = vmatpush3.bf16.msra.mxu1 %v2263_v24 }
 0x12c   : > { %1815 = vmatprep.subr.bf16.mxu1 %v2021_v1 }
 0x12f   : > { %1817 = vmatpush3.bf16.msra.mxu1 %v2273_v27 }
 0x130   : > { %1818 = vmatprep.subr.bf16.mxu1 %v2021_v1 }
 0x133   : > { %1820 = vmatpush3.bf16.msra.mxu1 %v1795_v30 }
 0x134   : > { %1821 = vmatprep.subr.bf16.mxu1 %v2021_v1 }
 0x137   : > { %1823 = vmatpush3.bf16.msra.mxu1 %v1798_v33 }
 0x138   : > { %1824 = vmatprep.subr.bf16.mxu1 %v2021_v1 }
 0x13b   : > { %1826 = vmatpush3.bf16.msra.mxu1 %v1801_v36 }
 0x1f1   : > { %v773_v3 = vpop.f32.mrb[4].mxu1 }
 0x1f2   : > { %v778_v4 = vmul.f32 0.00390625, %v773_v3  ;;  %v1676_v5 = vpop.f32.mrb[5].mxu1 }
 0x1f3   : > { %v1101_v5 = vld [vmem:[%s2443_s4 + $0x8] sm:$0xff] }
 0x1f4   : > { %1680 = vmatmul.mubr.msk.f32.vlgmr.msra.gmra.mrb[4].mxu0 %vm780_vm10, %v778_v4 }
 0x1f5   : > { %1718 = vmatpush3.msra.mxu0 %v779_v38  ;;  %1719 = vmatprep.mubr.msk.f32.mxu0 %vm2022_vm8, %v2023_v37 }
 0x2c7   : > { %v850_v12 = vpop.f32.mrb[4].mxu0 }
 0x2c8   : > { %v861_v13 = vrot.slane %v850_v12, %v860_v11  ;;  %v1681_v1 = vpop.f32.mrb[5].mxu0 }
 0x2ca   : > { %v862_v16 = vcombine.high %v861_v13, %v861_v13  ;;  %v869_v14 = vrot.slane %v861_v13, %v860_v11  ;;  %v1279_v13 = vld [vmem:[%s2445_s6 + $0x20] sm:$0xff] }
 0x2cc   : > { %v876_v17 = vrot.slane %v862_v16, %v860_v11  ;;  %v880_v18 = vrot.slane %v869_v14, %v879_v15  ;;  %v1281_v16 = vld [vmem:[%s2445_s6 + $0x30] sm:$0xff]  ;;  %v1282_v14 = vld [vmem:[%s2445_s6 + $0x38] sm:$0xff] }
 0x2ce   : > { %v884_v19 = vrot.slane %v876_v17, %v879_v15  ;;  %v887_v20 = vsub.f32 %v1876_v46, %v880_v18  ;;  %v888_v21 = vsub.f32 %v1878_v50, %v880_v18  ;;  %v1855_v17 = vpack.c.bf16 %v1282_v14, %v1281_v16  ;;  %v1283_v18 = vld [vmem:[%s2445_s6 + $0x40] sm:$0xff] }
 0x2d0   : > { %v889_v22 = vsub.f32 %v2303_v44, %v884_v19  ;;  %v890_v23 = vsub.f32 %v1877_v48, %v884_v19  ;;  %v891_v24 = vmul.f32 %v887_v20, %v887_v20  ;;  %v892_v25 = vmul.f32 %v888_v21, %v888_v21  ;;  %v1100_v48 = vld [vmem:[%s2443_s4] sm:$0xff]  ;;  %v1284_v19 = vld [vmem:[%s2445_s6 + $0x48] sm:$0xff] }
 0x2d2   : > { %v893_v26 = vmul.f32 %v889_v22, %v889_v22  ;;  %v894_v27 = vmul.f32 %v890_v23, %v890_v23  ;;  %v895_v28 = vadd.f32 %v892_v25, %v891_v24  ;;  %v1287_v24 = vld [vmem:[%s2445_s6 + $0x60] sm:$0xff]  ;;  %v1288_v25 = vld [vmem:[%s2445_s6 + $0x68] sm:$0xff] }
 0x2d4   : > { %v896_v29 = vrot.slane %v895_v28, 4  ;;  %v902_v30 = vadd.f32 %v894_v27, %v893_v26  ;;  %v1867_v26 = vpack.c.bf16 %v1288_v25, %v1287_v24  ;;  %v1289_v27 = vld [vmem:[%s2445_s6 + $0x70] sm:$0xff] }
 0x2d6   : > { %v897_v31 = vadd.f32 %v896_v29, %v895_v28  ;;  %v903_v32 = vrot.slane %v902_v30, 4  ;;  %v1290_v28 = vld [vmem:[%s2445_s6 + $0x78] sm:$0xff] }
 0x2d7   : > { %v1871_v29 = vpack.c.bf16 %v1290_v28, %v1289_v27 }
 0x2d8   : > { %v898_v33 = vrot.slane %v897_v31, 2  ;;  %v904_v34 = vadd.f32 %v903_v32, %v902_v30 }
 0x2da   : > { %v899_v35 = vadd.f32 %v898_v33, %v897_v31  ;;  %v905_v36 = vrot.slane %v904_v34, 2 }
 0x2dc   : > { %v900_v37 = vrot.slane %v899_v35, 1  ;;  %v906_v38 = vadd.f32 %v905_v36, %v904_v34 }
 0x2de   : > { %v907_v39 = vrot.slane %v906_v38, 1  ;;  %v901_v40 = vadd.f32 %v900_v37, %v899_v35 }
 0x2e0   : > { %v908_v41 = vadd.f32 %v907_v39, %v906_v38 }
 0x2e2   : > { %v911_v42 = vsel %vm704_vm9, %v908_v41, %v901_v40 }
 0x2e3   : > { %1715 = vmatmul.mubr.f32.vlgmr.msra.gmra.mrb[6].mxu1 %v911_v42 }
 0x2e4   : > { %1741 = vmatprep.mubr.msk.f32.mxu1 %vm1102_vm11, %v1184_v49 }
 0x3b6   : > { %v979_v43 = vpop.f32.mrb[6].mxu1 }
 0x3b7   : > { %v983_v44 = vmul.f32 0.00390625, %v979_v43  ;;  %v1716_v45 = vpop.f32.mrb[7].mxu1 }
 0x3b9   : > { %v984_v46 = vadd.f32 1e-05, %v983_v44 }
 0x3bb   : > { %1955 = vrsqrt.f32 %v984_v46 }
 0x3c5   : > { %v1956_v47 = vpop.eup %1955 }
 0x3c6   : > { %1720 = vmatmul.mubr.msk.f32.vlgmr.msra.gmra.mrb[6].mxu0 %vm780_vm10, %v1956_v47 }
 0x3c7   : > { %1730 = vmatprep.mubr.msk.f32.mxu0 %vm1102_vm11, %v1100_v48 }
 0x499   : > { %v1055_v50 = vpop.f32.mrb[6].mxu0 }
 0x49a   : > { %v1066_v51 = vrot.slane %v1055_v50, %v860_v11  ;;  %v1721_v52 = vpop.f32.mrb[7].mxu0 }
 0x49c   : > { %v1067_v53 = vcombine.high %v1066_v51, %v1066_v51  ;;  %v1074_v54 = vrot.slane %v1066_v51, %v860_v11 }
 0x49e   : > { %v1081_v55 = vrot.slane %v1067_v53, %v860_v11  ;;  %v1085_v56 = vrot.slane %v1074_v54, %v879_v15  ;;  %v1278_v11 = vld [vmem:[%s2445_s6 + $0x18] sm:$0xff] }
 0x49f   : > { %v1847_v12 = vpack.c.bf16 %v1278_v11, %v1277_v9 }
 0x4a0   : > { %v1089_v57 = vrot.slane %v1081_v55, %v879_v15  ;;  %v1092_v58 = vmul.f32 %v1085_v56, %v887_v20  ;;  %v1093_v59 = vmul.f32 %v1085_v56, %v888_v21  ;;  %v1280_v15 = vld [vmem:[%s2445_s6 + $0x28] sm:$0xff]  ;;  %v1859_v20 = vpack.c.bf16 %v1284_v19, %v1283_v18  ;;  %v1285_v21 = vld [vmem:[%s2445_s6 + $0x50] sm:$0xff] }
 0x4a1   : > { %v1851_v1 = vpack.c.bf16 %v1280_v15, %v1279_v13 }
 0x4a2   : > { %v1094_v60 = vmul.f32 %v1089_v57, %v889_v22  ;;  %v1095_v61 = vmul.f32 %v1089_v57, %v890_v23  ;;  %v1096_v62 = vmax.f32 %v1092_v58, 0.0  ;;  %v1097_v63 = vmax.f32 %v1093_v59, 0.0  ;;  %v1286_v22 = vld [vmem:[%s2445_s6 + $0x58] sm:$0xff] }
 0x4a3   : > { %v1863_v23 = vpack.c.bf16 %v1286_v22, %v1285_v21 }
 0x4a4   : > { %v1098_v0 = vmax.f32 %v1094_v60, 0.0  ;;  %v1099_v2 = vmax.f32 %v1095_v61, 0.0  ;;  %v1827_v3 = vpack.c.bf16 %v1097_v63, %v1096_v62 }
 0x4a6   : > { %1828 = vmatprep.subr.bf16.mxu0 %v1827_v3  ;;  %1836 = vmatprep.subr.bf16.mxu1 %v1827_v3  ;;  %v1831_v4 = vpack.c.bf16 %v1099_v2, %v1098_v0 }
 0x4a7   : > { %1830 = vmatpush3.bf16.msra.mxu0 %v1827_v3  ;;  %1838 = vmatpush3.bf16.msra.mxu1 %v1827_v3 }
 0x4a8   : > { %1832 = vmatprep.subr.bf16.mxu0 %v1831_v4  ;;  %1840 = vmatprep.subr.bf16.mxu1 %v1831_v4 }
 0x4ab   : > { %1834 = vmatpush3.bf16.msra.mxu0 %v1831_v4  ;;  %1842 = vmatpush3.bf16.msra.mxu1 %v1831_v4 }
 0x4ac   : > { %1844 = vmatprep.subr.bf16.mxu0 %v1843_v10 }
 0x4ae   : > { %1731 = vmatmul.mubr.msk.f32.vlgmr.msra.gmra.mrb[8].mxu0 %vm1102_vm11, %v1101_v5  ;;  %1742 = vmatmul.mubr.msk.f32.vlgmr.msra.gmra.mrb[8].mxu1 %vm1102_vm11, %v1185_v6 }
 0x4af   : > { %1846 = vmatpush3.bf16.msra.mxu0 %v1843_v10 }
 0x4b0   : > { %1848 = vmatprep.subr.bf16.mxu0 %v1847_v12 }
 0x4b3   : > { %1850 = vmatpush3.bf16.msra.mxu0 %v1847_v12 }
 0x4b4   : > { %1852 = vmatprep.subr.bf16.mxu0 %v1851_v1 }
 0x4b7   : > { %1854 = vmatpush3.bf16.msra.mxu0 %v1851_v1 }
 0x4b8   : > { %1856 = vmatprep.subr.bf16.mxu0 %v1855_v17 }
 0x4bb   : > { %1858 = vmatpush3.bf16.msra.mxu0 %v1855_v17 }
 0x4bc   : > { %1860 = vmatprep.subr.bf16.mxu0 %v1859_v20 }
 0x4bf   : > { %1862 = vmatpush3.bf16.msra.mxu0 %v1859_v20 }
 0x4c0   : > { %1864 = vmatprep.subr.bf16.mxu0 %v1863_v23 }
 0x4c3   : > { %1866 = vmatpush3.bf16.msra.mxu0 %v1863_v23 }
 0x4c4   : > { %1868 = vmatprep.subr.bf16.mxu0 %v1867_v26 }
 0x4c7   : > { %1870 = vmatpush3.bf16.msra.mxu0 %v1867_v26 }
 0x4c8   : > { %1872 = vmatprep.subr.bf16.mxu0 %v1871_v29 }
 0x4cb   : > { %1874 = vmatpush3.bf16.msra.mxu0 %v1871_v29 }
 0x581   : > { %v1732_v30 = vpop.f32.mrb[8].mxu0  ;;  %v1743_v31 = vpop.f32.mrb[8].mxu1 }
 0x582   : > { %v1268_v32 = vmax.f32 %v1732_v30, %v1743_v31  ;;  %v1175_v33 = vpop.f32.mrb[9].mxu0  ;;  %v1258_v34 = vpop.f32.mrb[9].mxu1 }
 0x583   : > { %v1267_v35 = vmax.f32 %v1175_v33, %v1258_v34 }
 0x585   : > { %v1933_v36 = vpack.i.bf16 %v1268_v32, %v1267_v35 }
 0x587   : > { %1934 = vrot.lane.b32.xlu0 %v1933_v36, %s2025_s29 }
 0x5f9   : > { %v1935_v37 = vpop.permute.xlu0 %1934 }
 0x5fa   : > { %v1937_v38 = vunpack.i.h.bf16 %v1935_v37  ;;  %v1936_v39 = vunpack.i.l.bf16 %v1935_v37 }
 0x5fc   : > { %v1274_v40 = vmax.f32 %v1268_v32, %v1937_v38  ;;  %v1273_v41 = vmax.f32 %v1267_v35, %v1936_v39 }
 0x5fe   : > { %1776 = vmatprep.mubr.f32.mxu0 %v1273_v41 }
 0x5ff   : > { %1777 = vmatmul.mubr.f32.vlgmr.msra.gmra.mrb[10].mxu0 %v1274_v40 }
 0x6d2   : > { %v1778_v42 = vpop.f32.mrb[10].mxu0 }
 0x6d3   : > { %1368 = vst.msk [vmem:[%s274_s13 + $0x8] sm:$0xff] %vm1366_vm12, %v1778_v42  ;;  %v1357_v43 = vpop.f32.mrb[11].mxu0 }
 0x6d4   : > { %1367 = vst.msk [vmem:[%s274_s13] sm:$0xff] %vm1366_vm12, %v1357_v43 }
 0x6d5   : > { %1970 = shalt.err (!%p1967_p3)
}
 0x6d6   : > { %s1971_s23 = scalar_lea.hbm %s2396_s17, 256  ;;  %s1975_s9 = scalar_lea.hbm %s2446_s7, 512 }
 0x6d7   : > { %p1972_p4 = scmp.ne.s32.totalorder %s2396_s17, %s1971_s23  ;;  %p1976_p9 = scmp.lt.u32.totalorder %s2396_s17, %s2446_s7 }
 0x6d8   : > { %p1977_p10 = scmp.lt.u32.totalorder %s1975_s9, %s1971_s23  ;;  %p1979_p12 = scmp.lt.u32.totalorder %s1971_s23, %s2396_s17 }
 0x6d9   : > { %p1973_p7 = pnand %p1972_p4, %p2107_p5 }
 0x6da   : > { %p1978_p11 = por %p1977_p10, %p1976_p9 }
 0x6db   : > { %p1974_p8 = pneg %p1973_p7 }
 0x6dc   : > { %p1980_p13 = por %p1979_p12, %p1978_p11 }
 0x6de   : > { %p1981_p0 = pnand %p1980_p13, %p1974_p8 }
 0x6e0   : > { %1984 = shalt.err (!%p1981_p0)
}
 0x6e1   : > { %s2027_s16 = smov 128   ;;  %s2028_s18 = smov 8  }
 0x6e2   : > { %1887 = dma.vmem_to_hbm [thread:$0]  (%p2107_p5), %s2391_s14, 256, %s2396_s17, %s2398_s19, %s2027_s16, %s2027_s16, %s2028_s18  }
 0x6e3 PF: > { %p1893_p1 = scmp.ge.s32.totalorder %s2019_s27, 2  ;;  %s1398_s20 = sand.u32 1, %s2007_s24  }
 0x6e4   : > { %s1399_s28 = scalar_lea.sflag [#allocation3], %s1398_s20 }
 0x6e5   : > { %p1890_p2 = pnand %p1893_p1, %p2111_p6 }
 0x6e7   : > { %2002 = dma.done.wait (!%p1890_p2), %s1399_s28, 256  }
 0x6e8   : > { %2004 = vsyncadd (!%p1890_p2), %s1399_s28, 4294967040  ;;  %p17_p3 = scmp.ge.s32.totalorder %s2094_s30, 4   ;;  %s2453_s24 = smov %s2011_s25 }
 0x6e9   : > { %s2454_s25 = smov %s2015_s26  ;;  %s2455_s26 = smov %s2105_s10 }
 0x6ea   : > { %s2456_s27 = smov %s2094_s30  ;;  %19 = sbr.rel (!%p17_p3) target bundleno = 3 (0x3), region = 85 }
 0x6f1   :  { %1404 = vsyncpa [#allocation3], 1 }
 0x6f2   :  { %1406 = vsyncpa [#allocation3 + $0x1], 1 }

</bundles_post_ra>
